<compile_context>
chip_gen: v5e
topology: v5e:2x2
jax: 0.10.0
libtpu: 0.0.40
codegen_flags: <defaults>
</compile_context>

<pallas_src>
import math

import jax
import jax.numpy as jnp
from jax.experimental import pallas as pl
from jax.experimental.pallas import tpu as pltpu

# ---- small test dimensions -------------------------------------------------
B, T, D, H, DFF = 2, 8, 32, 4, 64
DK = D // H
EPS = 1e-12
NEG_INF = -1e30


def _layernorm(x, gamma, beta, eps=EPS):
    mu = jnp.mean(x, axis=-1, keepdims=True)
    var = jnp.mean((x - mu) ** 2, axis=-1, keepdims=True)
    return (x - mu) * jax.lax.rsqrt(var + eps) * gamma + beta


def encoder_layer_kernel(x_ref, m_ref,
                         g1_ref, be1_ref,
                         wqkv_ref, bqkv_ref,
                         wo_ref, bo_ref,
                         g2_ref, be2_ref,
                         w1_ref, b1_ref, w2_ref, b2_ref,
                         o_ref):
    bb = x_ref.shape[0]                 # batches handled by this grid step (static)

    wqkv = wqkv_ref[...]                # (H, D, 3*DK)  (Q part pre-scaled by 1/sqrt(DK))
    bqkv = bqkv_ref[...]                # (H, 1, 3*DK)
    wo_h = wo_ref[...]                  # (H, DK, D)
    bo = bo_ref[0]                      # (D,)
    g1, be1 = g1_ref[0], be1_ref[0]
    g2, be2 = g2_ref[0], be2_ref[0]
    w1, b1 = w1_ref[...], b1_ref[0]
    w2, b2 = w2_ref[...], b2_ref[0]

    for b in range(bb):                 # static unroll (bb is 1 or B)
        x = x_ref[b]                    # (T, D)
        keep = m_ref[b] > 0.0           # (1, T) over key positions
        keep_f = keep.astype(jnp.float32)
        mask_bias = jnp.where(keep, 0.0, NEG_INF)          # (1, T), computed once

        # ---------------- self-attention block ----------------
        xn = _layernorm(x, g1, be1)                          # (T, D)

        # One fused, head-batched Q/K/V projection: (H,T,D) x (H,D,3DK) -> (H,T,3DK)
        xb = jnp.broadcast_to(xn[None, :, :], (H, T, D))
        qkv = jnp.einsum('htd,hde->hte', xb, wqkv,
                         preferred_element_type=jnp.float32) + bqkv
        q = qkv[..., :DK]                                    # (H, T, DK), already scaled
        k = qkv[..., DK:2 * DK]                              # (H, T, DK)
        v = qkv[..., 2 * DK:]                                # (H, T, DK)

        # Batched attention over all heads at once.
        scores = jnp.einsum('htd,hsd->hts', q, k,
                            preferred_element_type=jnp.float32)      # (H, T, T)
        scores = scores + mask_bias[None, :, :]
        smax = jnp.max(scores, axis=-1, keepdims=True)
        p = jnp.exp(scores - smax)
        denom = jnp.sum(p, axis=-1, keepdims=True)
        p = p * pl.reciprocal(denom, approx=True)            # EUP, not VPU divide
        p = p * keep_f[None, :, :]                           # ESPnet zeroes masked cols

        ctx = jnp.einsum('hts,hsd->htd', p, v,
                         preferred_element_type=jnp.float32)          # (H, T, DK)
        # Output projection with Wo head-blocked; the head "concat" becomes a sum.
        proj = jnp.einsum('htk,hkd->htd', ctx, wo_h,
                          preferred_element_type=jnp.float32)         # (H, T, D)
        att = proj[0]
        for h in range(1, H):
            att = att + proj[h]
        x1 = x + att + bo                                    # residual (dropout = id)

        # ---------------- feed-forward block ----------------
        xn2 = _layernorm(x1, g2, be2)
        hdn = jnp.dot(xn2, w1, preferred_element_type=jnp.float32) + b1
        hdn = jnp.maximum(hdn, 0.0)
        ff = jnp.dot(hdn, w2, preferred_element_type=jnp.float32) + b2
        o_ref[b] = (x1 + ff).astype(o_ref.dtype)


def _full_spec(shape):
    # whole (untiled) parameter, same block at every grid step
    return pl.BlockSpec(shape, lambda b: tuple(0 for _ in shape))


def _detect_batch_parallel():
    # v7x has 2 TensorCores/chip -> keep a parallel batch grid axis so both
    # cores get work.  v5e/v6e are single-TC -> collapse the grid to one step
    # (per-step overhead ~0.35us would rival this tiny kernel's compute).
    try:
        kind = jax.devices()[0].device_kind.lower()
    except Exception:
        return False
    return "7" in kind


_BATCH_PARALLEL = _detect_batch_parallel()


def _prepare_params(params):
    """Fuse raw (Wq,bq,Wk,bk,Wv,bv,Wo) into head-blocked slabs (wrapper-side)."""
    (g1, be1, wq, bq, wk, bk, wv, bv, wo, bo, g2, be2, w1, b1, w2, b2) = params
    inv_scale = 1.0 / math.sqrt(DK)
    wq_s, bq_s = wq * inv_scale, bq * inv_scale       # fold 1/sqrt(dk) into Q proj
    wqkv = jnp.stack(
        [jnp.concatenate([wq_s[:, h * DK:(h + 1) * DK],
                          wk[:, h * DK:(h + 1) * DK],
                          wv[:, h * DK:(h + 1) * DK]], axis=1)
         for h in range(H)], axis=0)                  # (H, D, 3*DK)
    bqkv = jnp.stack(
        [jnp.concatenate([bq_s[:, h * DK:(h + 1) * DK],
                          bk[:, h * DK:(h + 1) * DK],
                          bv[:, h * DK:(h + 1) * DK]], axis=1)
         for h in range(H)], axis=0)                  # (H, 1, 3*DK)
    wo_h = wo.reshape(H, DK, D)                       # (H, DK, D)
    return (g1, be1, wqkv, bqkv, wo_h, bo, g2, be2, w1, b1, w2, b2)


@jax.jit
def encoder_layer(x, mask, params):
    fused = _prepare_params(params)
    (g1, be1, wqkv, bqkv, wo_h, bo, g2, be2, w1, b1, w2, b2) = fused

    bb = 1 if _BATCH_PARALLEL else B                  # batches per grid step
    nb = B // bb                                      # grid size

    in_specs = [
        pl.BlockSpec((bb, T, D), lambda b: (b, 0, 0)),      # x
        pl.BlockSpec((bb, 1, T), lambda b: (b, 0, 0)),      # mask
        _full_spec((1, D)), _full_spec((1, D)),             # ln1 gamma / beta
        _full_spec((H, D, 3 * DK)),                         # fused Wqkv (head-blocked)
        _full_spec((H, 1, 3 * DK)),                         # fused bqkv
        _full_spec((H, DK, D)), _full_spec((1, D)),         # Wo (head-blocked) / bo
        _full_spec((1, D)), _full_spec((1, D)),             # ln2 gamma / beta
        _full_spec((D, DFF)), _full_spec((1, DFF)),         # W1 / b1
        _full_spec((DFF, D)), _full_spec((1, D)),           # W2 / b2
    ]

    flops = (2 * B * T * D * 3 * D          # fused QKV projection
             + 4 * B * H * T * T * DK       # scores + context
             + 2 * B * T * D * D            # output projection
             + 4 * B * T * D * DFF)         # FFN
    transcendentals = B * H * T * T + 4 * B * T
    bytes_accessed = 4 * (x.size + mask.size + B * T * D
                          + sum(int(p.size) for p in fused))
    cost = pl.CostEstimate(flops=flops, transcendentals=transcendentals,
                           bytes_accessed=bytes_accessed)

    return pl.pallas_call(
        encoder_layer_kernel,
        out_shape=jax.ShapeDtypeStruct((B, T, D), jnp.float32),
        grid_spec=pltpu.PrefetchScalarGridSpec(
            num_scalar_prefetch=0,
            grid=(nb,),
            in_specs=in_specs,
            out_specs=pl.BlockSpec((bb, T, D), lambda b: (b, 0, 0)),
        ),
        compiler_params=pltpu.CompilerParams(
            dimension_semantics=("parallel",) if _BATCH_PARALLEL else ("arbitrary",)),
        cost_estimate=cost,
    )(x, mask, g1, be1, wqkv, bqkv, wo_h, bo, g2, be2, w1, b1, w2, b2)


# ---------------- pure-JAX reference for verification ----------------
def reference(x, mask, params):
    (g1, be1, wq, bq, wk, bk, wv, bv, wo, bo, g2, be2, w1, b1, w2, b2) = params

    def ln(z, g, b):
        mu = z.mean(-1, keepdims=True)
        var = ((z - mu) ** 2).mean(-1, keepdims=True)
        return (z - mu) / jnp.sqrt(var + EPS) * g + b

    residual = x
    xn = ln(x, g1, be1)
    q = xn @ wq + bq
    k = xn @ wk + bk
    v = xn @ wv + bv
    qh = q.reshape(B, T, H, DK).transpose(0, 2, 1, 3)
    kh = k.reshape(B, T, H, DK).transpose(0, 2, 1, 3)
    vh = v.reshape(B, T, H, DK).transpose(0, 2, 1, 3)
    scores = jnp.einsum('bhtd,bhsd->bhts', qh, kh) / jnp.sqrt(jnp.float32(DK))
    keep = (mask > 0)[:, :, None, :]          # (B,1,1,T)
    scores = jnp.where(keep, scores, jnp.float32(NEG_INF))
    p = jax.nn.softmax(scores, axis=-1)
    p = jnp.where(keep, p, 0.0)
    att = jnp.einsum('bhts,bhsd->bhtd', p, vh).transpose(0, 2, 1, 3).reshape(B, T, D)
    x1 = residual + att @ wo + bo
    xn2 = ln(x1, g2, be2)
    ff = jnp.maximum(xn2 @ w1 + b1, 0.0) @ w2 + b2
    return x1 + ff


if __name__ == "__main__":
    key = jax.random.PRNGKey(0)
    ks = jax.random.split(key, 16)

    def w(k, shape, scale=0.05):
        return jax.random.normal(k, shape, jnp.float32) * scale

    params = (
        jnp.ones((1, D), jnp.float32),          # ln1 gamma
        jnp.zeros((1, D), jnp.float32),         # ln1 beta
        w(ks[0], (D, D)),  w(ks[1], (1, D)),    # Wq, bq
        w(ks[2], (D, D)),  w(ks[3], (1, D)),    # Wk, bk
        w(ks[4], (D, D)),  w(ks[5], (1, D)),    # Wv, bv
        w(ks[6], (D, D)),  w(ks[7], (1, D)),    # Wo, bo
        jnp.ones((1, D), jnp.float32),          # ln2 gamma
        jnp.zeros((1, D), jnp.float32),         # ln2 beta
        w(ks[8], (D, DFF)), w(ks[9], (1, DFF)), # W1, b1
        w(ks[10], (DFF, D)), w(ks[11], (1, D)), # W2, b2
    )

    x = jax.random.normal(ks[12], (B, T, D), jnp.float32)
    # batch 0: full length, batch 1: only first 6 positions valid
    mask = jnp.stack([
        jnp.ones((1, T), jnp.float32),
        jnp.concatenate([jnp.ones((1, 6), jnp.float32),
                         jnp.zeros((1, T - 6), jnp.float32)], axis=-1),
    ], axis=0)                                  # (B, 1, T)

    out = encoder_layer(x, mask, params)
    out = jax.block_until_ready(out)

    ref = reference(x, mask, params)
    assert out.shape == (B, T, D)
    # Tolerance 1e-3: the softmax normalisation uses the EUP approximate
    # reciprocal (pl.reciprocal(approx=True)); everything else is exact f32.
    assert jnp.allclose(out, ref, atol=1e-3, rtol=1e-3), float(jnp.max(jnp.abs(out - ref)))

    print("KERNEL_OK")
</pallas_src>

<mosaic_0001>
module attributes {stable_mosaic.version = 11 : i64} {
  func.func @encoder_layer_kernel(%arg0: i32, %arg1: memref<2x8x32xf32, #tpu.memory_space<vmem>>, %arg2: memref<2x1x8xf32, #tpu.memory_space<vmem>>, %arg3: memref<1x32xf32, #tpu.memory_space<vmem>>, %arg4: memref<1x32xf32, #tpu.memory_space<vmem>>, %arg5: memref<4x32x24xf32, #tpu.memory_space<vmem>>, %arg6: memref<4x1x24xf32, #tpu.memory_space<vmem>>, %arg7: memref<4x8x32xf32, #tpu.memory_space<vmem>>, %arg8: memref<1x32xf32, #tpu.memory_space<vmem>>, %arg9: memref<1x32xf32, #tpu.memory_space<vmem>>, %arg10: memref<1x32xf32, #tpu.memory_space<vmem>>, %arg11: memref<32x64xf32, #tpu.memory_space<vmem>>, %arg12: memref<1x64xf32, #tpu.memory_space<vmem>>, %arg13: memref<64x32xf32, #tpu.memory_space<vmem>>, %arg14: memref<1x32xf32, #tpu.memory_space<vmem>>, %arg15: memref<2x8x32xf32, #tpu.memory_space<vmem>>) attributes {dimension_semantics = [#tpu.dimension_semantics<arbitrary>], iteration_bounds = array<i64: 1>, scalar_prefetch = 0 : i64, scratch_operands = 0 : i64, tpu.core_type = #tpu.core_type<tc>, window_params = [{transform_indices = @transform_0, window_bounds = array<i64: 2, 8, 32>}, {transform_indices = @transform_1, window_bounds = array<i64: 2, 1, 8>}, {pipeline_mode = #tpu.pipeline_mode<synchronous>, transform_indices = @transform_2, window_bounds = array<i64: 1, 32>}, {pipeline_mode = #tpu.pipeline_mode<synchronous>, transform_indices = @transform_3, window_bounds = array<i64: 1, 32>}, {pipeline_mode = #tpu.pipeline_mode<synchronous>, transform_indices = @transform_4, window_bounds = array<i64: 4, 32, 24>}, {pipeline_mode = #tpu.pipeline_mode<synchronous>, transform_indices = @transform_5, window_bounds = array<i64: 4, 1, 24>}, {pipeline_mode = #tpu.pipeline_mode<synchronous>, transform_indices = @transform_6, window_bounds = array<i64: 4, 8, 32>}, {pipeline_mode = #tpu.pipeline_mode<synchronous>, transform_indices = @transform_7, window_bounds = array<i64: 1, 32>}, {pipeline_mode = #tpu.pipeline_mode<synchronous>, transform_indices = @transform_8, window_bounds = array<i64: 1, 32>}, {pipeline_mode = #tpu.pipeline_mode<synchronous>, transform_indices = @transform_9, window_bounds = array<i64: 1, 32>}, {pipeline_mode = #tpu.pipeline_mode<synchronous>, transform_indices = @transform_10, window_bounds = array<i64: 32, 64>}, {pipeline_mode = #tpu.pipeline_mode<synchronous>, transform_indices = @transform_11, window_bounds = array<i64: 1, 64>}, {pipeline_mode = #tpu.pipeline_mode<synchronous>, transform_indices = @transform_12, window_bounds = array<i64: 64, 32>}, {pipeline_mode = #tpu.pipeline_mode<synchronous>, transform_indices = @transform_13, window_bounds = array<i64: 1, 32>}, {transform_indices = @transform_14, window_bounds = array<i64: 2, 8, 32>}]} {
    %c0 = arith.constant 0 : index
    %c0_0 = arith.constant 0 : index
    %c0_1 = arith.constant 0 : index
    %0 = vector.load %arg5[%c0, %c0_0, %c0_1] : memref<4x32x24xf32, #tpu.memory_space<vmem>>, vector<4x32x24xf32>
    %c0_2 = arith.constant 0 : index
    %c0_3 = arith.constant 0 : index
    %c0_4 = arith.constant 0 : index
    %1 = vector.load %arg6[%c0_2, %c0_3, %c0_4] : memref<4x1x24xf32, #tpu.memory_space<vmem>>, vector<4x1x24xf32>
    %c0_5 = arith.constant 0 : index
    %c0_6 = arith.constant 0 : index
    %c0_7 = arith.constant 0 : index
    %2 = vector.load %arg7[%c0_5, %c0_6, %c0_7] : memref<4x8x32xf32, #tpu.memory_space<vmem>>, vector<4x8x32xf32>
    %c0_8 = arith.constant 0 : index
    %c0_9 = arith.constant 0 : index
    %3 = vector.load %arg8[%c0_8, %c0_9] : memref<1x32xf32, #tpu.memory_space<vmem>>, vector<1x32xf32>
    %4 = vector.shape_cast %3 : vector<1x32xf32> to vector<32xf32>
    %c0_10 = arith.constant 0 : index
    %c0_11 = arith.constant 0 : index
    %5 = vector.load %arg3[%c0_10, %c0_11] : memref<1x32xf32, #tpu.memory_space<vmem>>, vector<1x32xf32>
    %6 = vector.shape_cast %5 : vector<1x32xf32> to vector<32xf32>
    %c0_12 = arith.constant 0 : index
    %c0_13 = arith.constant 0 : index
    %7 = vector.load %arg4[%c0_12, %c0_13] : memref<1x32xf32, #tpu.memory_space<vmem>>, vector<1x32xf32>
    %8 = vector.shape_cast %7 : vector<1x32xf32> to vector<32xf32>
    %c0_14 = arith.constant 0 : index
    %c0_15 = arith.constant 0 : index
    %9 = vector.load %arg9[%c0_14, %c0_15] : memref<1x32xf32, #tpu.memory_space<vmem>>, vector<1x32xf32>
    %10 = vector.shape_cast %9 : vector<1x32xf32> to vector<32xf32>
    %c0_16 = arith.constant 0 : index
    %c0_17 = arith.constant 0 : index
    %11 = vector.load %arg10[%c0_16, %c0_17] : memref<1x32xf32, #tpu.memory_space<vmem>>, vector<1x32xf32>
    %12 = vector.shape_cast %11 : vector<1x32xf32> to vector<32xf32>
    %c0_18 = arith.constant 0 : index
    %c0_19 = arith.constant 0 : index
    %13 = vector.load %arg11[%c0_18, %c0_19] : memref<32x64xf32, #tpu.memory_space<vmem>>, vector<32x64xf32>
    %c0_20 = arith.constant 0 : index
    %c0_21 = arith.constant 0 : index
    %14 = vector.load %arg12[%c0_20, %c0_21] : memref<1x64xf32, #tpu.memory_space<vmem>>, vector<1x64xf32>
    %15 = vector.shape_cast %14 : vector<1x64xf32> to vector<64xf32>
    %c0_22 = arith.constant 0 : index
    %c0_23 = arith.constant 0 : index
    %16 = vector.load %arg13[%c0_22, %c0_23] : memref<64x32xf32, #tpu.memory_space<vmem>>, vector<64x32xf32>
    %c0_24 = arith.constant 0 : index
    %c0_25 = arith.constant 0 : index
    %17 = vector.load %arg14[%c0_24, %c0_25] : memref<1x32xf32, #tpu.memory_space<vmem>>, vector<1x32xf32>
    %18 = vector.shape_cast %17 : vector<1x32xf32> to vector<32xf32>
    %c0_26 = arith.constant 0 : index
    %c0_27 = arith.constant 0 : index
    %c0_28 = arith.constant 0 : index
    %19 = vector.load %arg1[%c0_26, %c0_27, %c0_28] : memref<2x8x32xf32, #tpu.memory_space<vmem>>, vector<1x8x32xf32>
    %20 = vector.shape_cast %19 : vector<1x8x32xf32> to vector<8x32xf32>
    %c0_29 = arith.constant 0 : index
    %c0_30 = arith.constant 0 : index
    %c0_31 = arith.constant 0 : index
    %21 = vector.load %arg2[%c0_29, %c0_30, %c0_31] : memref<2x1x8xf32, #tpu.memory_space<vmem>>, vector<1x1x8xf32>
    %22 = vector.shape_cast %21 : vector<1x1x8xf32> to vector<1x8xf32>
    %cst = arith.constant 0.000000e+00 : f32
    %23 = vector.broadcast %cst : f32 to vector<1x8xf32>
    %24 = arith.cmpf ogt, %22, %23 : vector<1x8xf32>
    %25 = arith.extui %24 : vector<1x8xi1> to vector<1x8xi32>
    %26 = arith.sitofp %25 : vector<1x8xi32> to vector<1x8xf32>
    %cst_32 = arith.constant 0.000000e+00 : f32
    %cst_33 = arith.constant -1.000000e+30 : f32
    %27 = vector.broadcast %cst_32 : f32 to vector<1x8xf32>
    %28 = vector.broadcast %cst_33 : f32 to vector<1x8xf32>
    %29 = arith.select %24, %27, %28 : vector<1x8xi1>, vector<1x8xf32>
    %cst_34 = arith.constant dense<0.000000e+00> : vector<8xf32>
    %30 = vector.multi_reduction <add>, %20, %cst_34 [1] : vector<8x32xf32> to vector<8xf32>
    %31 = vector.shape_cast %30 : vector<8xf32> to vector<8x1xf32>
    %cst_35 = arith.constant 3.200000e+01 : f32
    %32 = vector.broadcast %cst_35 : f32 to vector<8x1xf32>
    %33 = arith.divf %31, %32 : vector<8x1xf32>
    %34 = vector.broadcast %33 : vector<8x1xf32> to vector<8x32xf32>
    %35 = arith.subf %20, %34 : vector<8x32xf32>
    %36 = arith.mulf %35, %35 : vector<8x32xf32>
    %cst_36 = arith.constant dense<0.000000e+00> : vector<8xf32>
    %37 = vector.multi_reduction <add>, %36, %cst_36 [1] : vector<8x32xf32> to vector<8xf32>
    %38 = vector.shape_cast %37 : vector<8xf32> to vector<8x1xf32>
    %cst_37 = arith.constant 3.200000e+01 : f32
    %39 = vector.broadcast %cst_37 : f32 to vector<8x1xf32>
    %40 = arith.divf %38, %39 : vector<8x1xf32>
    %41 = vector.broadcast %33 : vector<8x1xf32> to vector<8x32xf32>
    %42 = arith.subf %20, %41 : vector<8x32xf32>
    %cst_38 = arith.constant 9.99999996E-13 : f32
    %43 = vector.broadcast %cst_38 : f32 to vector<8x1xf32>
    %44 = arith.addf %40, %43 : vector<8x1xf32>
    %45 = math.rsqrt %44 : vector<8x1xf32>
    %46 = vector.broadcast %45 : vector<8x1xf32> to vector<8x32xf32>
    %47 = arith.mulf %42, %46 : vector<8x32xf32>
    %48 = vector.shape_cast %6 : vector<32xf32> to vector<1x32xf32>
    %49 = vector.broadcast %48 : vector<1x32xf32> to vector<8x32xf32>
    %50 = arith.mulf %47, %49 : vector<8x32xf32>
    %51 = vector.shape_cast %8 : vector<32xf32> to vector<1x32xf32>
    %52 = vector.broadcast %51 : vector<1x32xf32> to vector<8x32xf32>
    %53 = arith.addf %50, %52 : vector<8x32xf32>
    %54 = vector.shape_cast %53 : vector<8x32xf32> to vector<1x8x32xf32>
    %55 = vector.shape_cast %54 : vector<1x8x32xf32> to vector<1x8x32xf32>
    %56 = vector.broadcast %55 : vector<1x8x32xf32> to vector<4x8x32xf32>
    "tpu.trace_start"() <{level = 10 : i32, message = "htd,hde->hte"}> : () -> ()
    %cst_39 = arith.constant dense<0.000000e+00> : vector<4x8x24xf32>
    %57 = tpu.matmul %56, %0, %cst_39 {dimension_numbers = #tpu.dot_dimension_numbers<[2], [1], [1], [2], [0, 0, 0, 1, 1, 2], [0], [0]>} : vector<4x8x32xf32>, vector<4x32x24xf32>, vector<4x8x24xf32> -> vector<4x8x24xf32>
    "tpu.trace_stop"() : () -> ()
    %58 = vector.broadcast %1 : vector<4x1x24xf32> to vector<4x8x24xf32>
    %59 = arith.addf %57, %58 : vector<4x8x24xf32>
    %60 = vector.extract_strided_slice %59 {offsets = [0, 0, 0], sizes = [4, 8, 8], strides = [1, 1, 1]} : vector<4x8x24xf32> to vector<4x8x8xf32>
    %61 = vector.extract_strided_slice %59 {offsets = [0, 0, 8], sizes = [4, 8, 8], strides = [1, 1, 1]} : vector<4x8x24xf32> to vector<4x8x8xf32>
    %62 = vector.extract_strided_slice %59 {offsets = [0, 0, 16], sizes = [4, 8, 8], strides = [1, 1, 1]} : vector<4x8x24xf32> to vector<4x8x8xf32>
    "tpu.trace_start"() <{level = 10 : i32, message = "htd,hsd->hts"}> : () -> ()
    %cst_40 = arith.constant dense<0.000000e+00> : vector<4x8x8xf32>
    %63 = tpu.matmul %60, %61, %cst_40 {dimension_numbers = #tpu.dot_dimension_numbers<[2], [2], [1], [1], [0, 0, 0, 1, 1, 1], [0], [0]>} : vector<4x8x8xf32>, vector<4x8x8xf32>, vector<4x8x8xf32> -> vector<4x8x8xf32>
    "tpu.trace_stop"() : () -> ()
    %64 = vector.shape_cast %29 : vector<1x8xf32> to vector<1x1x8xf32>
    %65 = vector.broadcast %64 : vector<1x1x8xf32> to vector<4x8x8xf32>
    %66 = arith.addf %63, %65 : vector<4x8x8xf32>
    %cst_41 = arith.constant dense<0xFF800000> : vector<4x8xf32>
    %67 = vector.multi_reduction <maximumf>, %66, %cst_41 [2] : vector<4x8x8xf32> to vector<4x8xf32>
    %68 = vector.shape_cast %67 : vector<4x8xf32> to vector<4x8x1xf32>
    %69 = vector.broadcast %68 : vector<4x8x1xf32> to vector<4x8x8xf32>
    %70 = arith.subf %66, %69 : vector<4x8x8xf32>
    %71 = math.exp %70 : vector<4x8x8xf32>
    %cst_42 = arith.constant dense<0.000000e+00> : vector<4x8xf32>
    %72 = vector.multi_reduction <add>, %71, %cst_42 [2] : vector<4x8x8xf32> to vector<4x8xf32>
    %73 = vector.shape_cast %72 : vector<4x8xf32> to vector<4x8x1xf32>
    %74 = tpu.reciprocal %73 {approx = true} : vector<4x8x1xf32> -> vector<4x8x1xf32>
    %75 = vector.broadcast %74 : vector<4x8x1xf32> to vector<4x8x8xf32>
    %76 = arith.mulf %71, %75 : vector<4x8x8xf32>
    %77 = vector.shape_cast %26 : vector<1x8xf32> to vector<1x1x8xf32>
    %78 = vector.broadcast %77 : vector<1x1x8xf32> to vector<4x8x8xf32>
    %79 = arith.mulf %76, %78 : vector<4x8x8xf32>
    "tpu.trace_start"() <{level = 10 : i32, message = "hts,hsd->htd"}> : () -> ()
    %cst_43 = arith.constant dense<0.000000e+00> : vector<4x8x8xf32>
    %80 = tpu.matmul %79, %62, %cst_43 {dimension_numbers = #tpu.dot_dimension_numbers<[2], [1], [1], [2], [0, 0, 0, 1, 1, 2], [0], [0]>} : vector<4x8x8xf32>, vector<4x8x8xf32>, vector<4x8x8xf32> -> vector<4x8x8xf32>
    "tpu.trace_stop"() : () -> ()
    "tpu.trace_start"() <{level = 10 : i32, message = "htk,hkd->htd"}> : () -> ()
    %cst_44 = arith.constant dense<0.000000e+00> : vector<4x8x32xf32>
    %81 = tpu.matmul %80, %2, %cst_44 {dimension_numbers = #tpu.dot_dimension_numbers<[2], [1], [1], [2], [0, 0, 0, 1, 1, 2], [0], [0]>} : vector<4x8x8xf32>, vector<4x8x32xf32>, vector<4x8x32xf32> -> vector<4x8x32xf32>
    "tpu.trace_stop"() : () -> ()
    %82 = vector.extract_strided_slice %81 {offsets = [0, 0, 0], sizes = [1, 8, 32], strides = [1, 1, 1]} : vector<4x8x32xf32> to vector<1x8x32xf32>
    %83 = vector.shape_cast %82 : vector<1x8x32xf32> to vector<8x32xf32>
    %84 = vector.extract_strided_slice %81 {offsets = [1, 0, 0], sizes = [1, 8, 32], strides = [1, 1, 1]} : vector<4x8x32xf32> to vector<1x8x32xf32>
    %85 = vector.shape_cast %84 : vector<1x8x32xf32> to vector<8x32xf32>
    %86 = arith.addf %83, %85 : vector<8x32xf32>
    %87 = vector.extract_strided_slice %81 {offsets = [2, 0, 0], sizes = [1, 8, 32], strides = [1, 1, 1]} : vector<4x8x32xf32> to vector<1x8x32xf32>
    %88 = vector.shape_cast %87 : vector<1x8x32xf32> to vector<8x32xf32>
    %89 = arith.addf %86, %88 : vector<8x32xf32>
    %90 = vector.extract_strided_slice %81 {offsets = [3, 0, 0], sizes = [1, 8, 32], strides = [1, 1, 1]} : vector<4x8x32xf32> to vector<1x8x32xf32>
    %91 = vector.shape_cast %90 : vector<1x8x32xf32> to vector<8x32xf32>
    %92 = arith.addf %89, %91 : vector<8x32xf32>
    %93 = arith.addf %20, %92 : vector<8x32xf32>
    %94 = vector.shape_cast %4 : vector<32xf32> to vector<1x32xf32>
    %95 = vector.broadcast %94 : vector<1x32xf32> to vector<8x32xf32>
    %96 = arith.addf %93, %95 : vector<8x32xf32>
    %cst_45 = arith.constant dense<0.000000e+00> : vector<8xf32>
    %97 = vector.multi_reduction <add>, %96, %cst_45 [1] : vector<8x32xf32> to vector<8xf32>
    %98 = vector.shape_cast %97 : vector<8xf32> to vector<8x1xf32>
    %cst_46 = arith.constant 3.200000e+01 : f32
    %99 = vector.broadcast %cst_46 : f32 to vector<8x1xf32>
    %100 = arith.divf %98, %99 : vector<8x1xf32>
    %101 = vector.broadcast %100 : vector<8x1xf32> to vector<8x32xf32>
    %102 = arith.subf %96, %101 : vector<8x32xf32>
    %103 = arith.mulf %102, %102 : vector<8x32xf32>
    %cst_47 = arith.constant dense<0.000000e+00> : vector<8xf32>
    %104 = vector.multi_reduction <add>, %103, %cst_47 [1] : vector<8x32xf32> to vector<8xf32>
    %105 = vector.shape_cast %104 : vector<8xf32> to vector<8x1xf32>
    %cst_48 = arith.constant 3.200000e+01 : f32
    %106 = vector.broadcast %cst_48 : f32 to vector<8x1xf32>
    %107 = arith.divf %105, %106 : vector<8x1xf32>
    %108 = vector.broadcast %100 : vector<8x1xf32> to vector<8x32xf32>
    %109 = arith.subf %96, %108 : vector<8x32xf32>
    %cst_49 = arith.constant 9.99999996E-13 : f32
    %110 = vector.broadcast %cst_49 : f32 to vector<8x1xf32>
    %111 = arith.addf %107, %110 : vector<8x1xf32>
    %112 = math.rsqrt %111 : vector<8x1xf32>
    %113 = vector.broadcast %112 : vector<8x1xf32> to vector<8x32xf32>
    %114 = arith.mulf %109, %113 : vector<8x32xf32>
    %115 = vector.shape_cast %10 : vector<32xf32> to vector<1x32xf32>
    %116 = vector.broadcast %115 : vector<1x32xf32> to vector<8x32xf32>
    %117 = arith.mulf %114, %116 : vector<8x32xf32>
    %118 = vector.shape_cast %12 : vector<32xf32> to vector<1x32xf32>
    %119 = vector.broadcast %118 : vector<1x32xf32> to vector<8x32xf32>
    %120 = arith.addf %117, %119 : vector<8x32xf32>
    %cst_50 = arith.constant dense<0.000000e+00> : vector<8x64xf32>
    %121 = tpu.matmul %120, %13, %cst_50 {dimension_numbers = #tpu.dot_dimension_numbers<[1], [0], [0], [1], [0, 0, 1, 1], [], []>} : vector<8x32xf32>, vector<32x64xf32>, vector<8x64xf32> -> vector<8x64xf32>
    %122 = vector.shape_cast %15 : vector<64xf32> to vector<1x64xf32>
    %123 = vector.broadcast %122 : vector<1x64xf32> to vector<8x64xf32>
    %124 = arith.addf %121, %123 : vector<8x64xf32>
    %cst_51 = arith.constant 0.000000e+00 : f32
    %125 = vector.broadcast %cst_51 : f32 to vector<8x64xf32>
    %126 = arith.maximumf %124, %125 : vector<8x64xf32>
    %cst_52 = arith.constant dense<0.000000e+00> : vector<8x32xf32>
    %127 = tpu.matmul %126, %16, %cst_52 {dimension_numbers = #tpu.dot_dimension_numbers<[1], [0], [0], [1], [0, 0, 1, 1], [], []>} : vector<8x64xf32>, vector<64x32xf32>, vector<8x32xf32> -> vector<8x32xf32>
    %128 = vector.shape_cast %18 : vector<32xf32> to vector<1x32xf32>
    %129 = vector.broadcast %128 : vector<1x32xf32> to vector<8x32xf32>
    %130 = arith.addf %127, %129 : vector<8x32xf32>
    %131 = arith.addf %96, %130 : vector<8x32xf32>
    %c0_53 = arith.constant 0 : index
    %c0_54 = arith.constant 0 : index
    %c0_55 = arith.constant 0 : index
    %132 = vector.load %arg15[%c0_53, %c0_54, %c0_55] : memref<2x8x32xf32, #tpu.memory_space<vmem>>, vector<1x8x32xf32>
    %133 = vector.shape_cast %132 : vector<1x8x32xf32> to vector<8x32xf32>
    %134 = vector.shape_cast %131 : vector<8x32xf32> to vector<1x8x32xf32>
    tpu.vector_store %arg15[%c0_53, %c0_54, %c0_55], %134 {strides = array<i32>} : memref<2x8x32xf32, #tpu.memory_space<vmem>>, vector<1x8x32xf32>,
    %c1 = arith.constant 1 : index
    %c0_56 = arith.constant 0 : index
    %c0_57 = arith.constant 0 : index
    %135 = vector.load %arg1[%c1, %c0_56, %c0_57] : memref<2x8x32xf32, #tpu.memory_space<vmem>>, vector<1x8x32xf32>
    %136 = vector.shape_cast %135 : vector<1x8x32xf32> to vector<8x32xf32>
    %c1_58 = arith.constant 1 : index
    %c0_59 = arith.constant 0 : index
    %c0_60 = arith.constant 0 : index
    %137 = vector.load %arg2[%c1_58, %c0_59, %c0_60] : memref<2x1x8xf32, #tpu.memory_space<vmem>>, vector<1x1x8xf32>
    %138 = vector.shape_cast %137 : vector<1x1x8xf32> to vector<1x8xf32>
    %cst_61 = arith.constant 0.000000e+00 : f32
    %139 = vector.broadcast %cst_61 : f32 to vector<1x8xf32>
    %140 = arith.cmpf ogt, %138, %139 : vector<1x8xf32>
    %141 = arith.extui %140 : vector<1x8xi1> to vector<1x8xi32>
    %142 = arith.sitofp %141 : vector<1x8xi32> to vector<1x8xf32>
    %cst_62 = arith.constant 0.000000e+00 : f32
    %cst_63 = arith.constant -1.000000e+30 : f32
    %143 = vector.broadcast %cst_62 : f32 to vector<1x8xf32>
    %144 = vector.broadcast %cst_63 : f32 to vector<1x8xf32>
    %145 = arith.select %140, %143, %144 : vector<1x8xi1>, vector<1x8xf32>
    %cst_64 = arith.constant dense<0.000000e+00> : vector<8xf32>
    %146 = vector.multi_reduction <add>, %136, %cst_64 [1] : vector<8x32xf32> to vector<8xf32>
    %147 = vector.shape_cast %146 : vector<8xf32> to vector<8x1xf32>
    %cst_65 = arith.constant 3.200000e+01 : f32
    %148 = vector.broadcast %cst_65 : f32 to vector<8x1xf32>
    %149 = arith.divf %147, %148 : vector<8x1xf32>
    %150 = vector.broadcast %149 : vector<8x1xf32> to vector<8x32xf32>
    %151 = arith.subf %136, %150 : vector<8x32xf32>
    %152 = arith.mulf %151, %151 : vector<8x32xf32>
    %cst_66 = arith.constant dense<0.000000e+00> : vector<8xf32>
    %153 = vector.multi_reduction <add>, %152, %cst_66 [1] : vector<8x32xf32> to vector<8xf32>
    %154 = vector.shape_cast %153 : vector<8xf32> to vector<8x1xf32>
    %cst_67 = arith.constant 3.200000e+01 : f32
    %155 = vector.broadcast %cst_67 : f32 to vector<8x1xf32>
    %156 = arith.divf %154, %155 : vector<8x1xf32>
    %157 = vector.broadcast %149 : vector<8x1xf32> to vector<8x32xf32>
    %158 = arith.subf %136, %157 : vector<8x32xf32>
    %cst_68 = arith.constant 9.99999996E-13 : f32
    %159 = vector.broadcast %cst_68 : f32 to vector<8x1xf32>
    %160 = arith.addf %156, %159 : vector<8x1xf32>
    %161 = math.rsqrt %160 : vector<8x1xf32>
    %162 = vector.broadcast %161 : vector<8x1xf32> to vector<8x32xf32>
    %163 = arith.mulf %158, %162 : vector<8x32xf32>
    %164 = vector.shape_cast %6 : vector<32xf32> to vector<1x32xf32>
    %165 = vector.broadcast %164 : vector<1x32xf32> to vector<8x32xf32>
    %166 = arith.mulf %163, %165 : vector<8x32xf32>
    %167 = vector.shape_cast %8 : vector<32xf32> to vector<1x32xf32>
    %168 = vector.broadcast %167 : vector<1x32xf32> to vector<8x32xf32>
    %169 = arith.addf %166, %168 : vector<8x32xf32>
    %170 = vector.shape_cast %169 : vector<8x32xf32> to vector<1x8x32xf32>
    %171 = vector.shape_cast %170 : vector<1x8x32xf32> to vector<1x8x32xf32>
    %172 = vector.broadcast %171 : vector<1x8x32xf32> to vector<4x8x32xf32>
    "tpu.trace_start"() <{level = 10 : i32, message = "htd,hde->hte"}> : () -> ()
    %cst_69 = arith.constant dense<0.000000e+00> : vector<4x8x24xf32>
    %173 = tpu.matmul %172, %0, %cst_69 {dimension_numbers = #tpu.dot_dimension_numbers<[2], [1], [1], [2], [0, 0, 0, 1, 1, 2], [0], [0]>} : vector<4x8x32xf32>, vector<4x32x24xf32>, vector<4x8x24xf32> -> vector<4x8x24xf32>
    "tpu.trace_stop"() : () -> ()
    %174 = vector.broadcast %1 : vector<4x1x24xf32> to vector<4x8x24xf32>
    %175 = arith.addf %173, %174 : vector<4x8x24xf32>
    %176 = vector.extract_strided_slice %175 {offsets = [0, 0, 0], sizes = [4, 8, 8], strides = [1, 1, 1]} : vector<4x8x24xf32> to vector<4x8x8xf32>
    %177 = vector.extract_strided_slice %175 {offsets = [0, 0, 8], sizes = [4, 8, 8], strides = [1, 1, 1]} : vector<4x8x24xf32> to vector<4x8x8xf32>
    %178 = vector.extract_strided_slice %175 {offsets = [0, 0, 16], sizes = [4, 8, 8], strides = [1, 1, 1]} : vector<4x8x24xf32> to vector<4x8x8xf32>
    "tpu.trace_start"() <{level = 10 : i32, message = "htd,hsd->hts"}> : () -> ()
    %cst_70 = arith.constant dense<0.000000e+00> : vector<4x8x8xf32>
    %179 = tpu.matmul %176, %177, %cst_70 {dimension_numbers = #tpu.dot_dimension_numbers<[2], [2], [1], [1], [0, 0, 0, 1, 1, 1], [0], [0]>} : vector<4x8x8xf32>, vector<4x8x8xf32>, vector<4x8x8xf32> -> vector<4x8x8xf32>
    "tpu.trace_stop"() : () -> ()
    %180 = vector.shape_cast %145 : vector<1x8xf32> to vector<1x1x8xf32>
    %181 = vector.broadcast %180 : vector<1x1x8xf32> to vector<4x8x8xf32>
    %182 = arith.addf %179, %181 : vector<4x8x8xf32>
    %cst_71 = arith.constant dense<0xFF800000> : vector<4x8xf32>
    %183 = vector.multi_reduction <maximumf>, %182, %cst_71 [2] : vector<4x8x8xf32> to vector<4x8xf32>
    %184 = vector.shape_cast %183 : vector<4x8xf32> to vector<4x8x1xf32>
    %185 = vector.broadcast %184 : vector<4x8x1xf32> to vector<4x8x8xf32>
    %186 = arith.subf %182, %185 : vector<4x8x8xf32>
    %187 = math.exp %186 : vector<4x8x8xf32>
    %cst_72 = arith.constant dense<0.000000e+00> : vector<4x8xf32>
    %188 = vector.multi_reduction <add>, %187, %cst_72 [2] : vector<4x8x8xf32> to vector<4x8xf32>
    %189 = vector.shape_cast %188 : vector<4x8xf32> to vector<4x8x1xf32>
    %190 = tpu.reciprocal %189 {approx = true} : vector<4x8x1xf32> -> vector<4x8x1xf32>
    %191 = vector.broadcast %190 : vector<4x8x1xf32> to vector<4x8x8xf32>
    %192 = arith.mulf %187, %191 : vector<4x8x8xf32>
    %193 = vector.shape_cast %142 : vector<1x8xf32> to vector<1x1x8xf32>
    %194 = vector.broadcast %193 : vector<1x1x8xf32> to vector<4x8x8xf32>
    %195 = arith.mulf %192, %194 : vector<4x8x8xf32>
    "tpu.trace_start"() <{level = 10 : i32, message = "hts,hsd->htd"}> : () -> ()
    %cst_73 = arith.constant dense<0.000000e+00> : vector<4x8x8xf32>
    %196 = tpu.matmul %195, %178, %cst_73 {dimension_numbers = #tpu.dot_dimension_numbers<[2], [1], [1], [2], [0, 0, 0, 1, 1, 2], [0], [0]>} : vector<4x8x8xf32>, vector<4x8x8xf32>, vector<4x8x8xf32> -> vector<4x8x8xf32>
    "tpu.trace_stop"() : () -> ()
    "tpu.trace_start"() <{level = 10 : i32, message = "htk,hkd->htd"}> : () -> ()
    %cst_74 = arith.constant dense<0.000000e+00> : vector<4x8x32xf32>
    %197 = tpu.matmul %196, %2, %cst_74 {dimension_numbers = #tpu.dot_dimension_numbers<[2], [1], [1], [2], [0, 0, 0, 1, 1, 2], [0], [0]>} : vector<4x8x8xf32>, vector<4x8x32xf32>, vector<4x8x32xf32> -> vector<4x8x32xf32>
    "tpu.trace_stop"() : () -> ()
    %198 = vector.extract_strided_slice %197 {offsets = [0, 0, 0], sizes = [1, 8, 32], strides = [1, 1, 1]} : vector<4x8x32xf32> to vector<1x8x32xf32>
    %199 = vector.shape_cast %198 : vector<1x8x32xf32> to vector<8x32xf32>
    %200 = vector.extract_strided_slice %197 {offsets = [1, 0, 0], sizes = [1, 8, 32], strides = [1, 1, 1]} : vector<4x8x32xf32> to vector<1x8x32xf32>
    %201 = vector.shape_cast %200 : vector<1x8x32xf32> to vector<8x32xf32>
    %202 = arith.addf %199, %201 : vector<8x32xf32>
    %203 = vector.extract_strided_slice %197 {offsets = [2, 0, 0], sizes = [1, 8, 32], strides = [1, 1, 1]} : vector<4x8x32xf32> to vector<1x8x32xf32>
    %204 = vector.shape_cast %203 : vector<1x8x32xf32> to vector<8x32xf32>
    %205 = arith.addf %202, %204 : vector<8x32xf32>
    %206 = vector.extract_strided_slice %197 {offsets = [3, 0, 0], sizes = [1, 8, 32], strides = [1, 1, 1]} : vector<4x8x32xf32> to vector<1x8x32xf32>
    %207 = vector.shape_cast %206 : vector<1x8x32xf32> to vector<8x32xf32>
    %208 = arith.addf %205, %207 : vector<8x32xf32>
    %209 = arith.addf %136, %208 : vector<8x32xf32>
    %210 = vector.shape_cast %4 : vector<32xf32> to vector<1x32xf32>
    %211 = vector.broadcast %210 : vector<1x32xf32> to vector<8x32xf32>
    %212 = arith.addf %209, %211 : vector<8x32xf32>
    %cst_75 = arith.constant dense<0.000000e+00> : vector<8xf32>
    %213 = vector.multi_reduction <add>, %212, %cst_75 [1] : vector<8x32xf32> to vector<8xf32>
    %214 = vector.shape_cast %213 : vector<8xf32> to vector<8x1xf32>
    %cst_76 = arith.constant 3.200000e+01 : f32
    %215 = vector.broadcast %cst_76 : f32 to vector<8x1xf32>
    %216 = arith.divf %214, %215 : vector<8x1xf32>
    %217 = vector.broadcast %216 : vector<8x1xf32> to vector<8x32xf32>
    %218 = arith.subf %212, %217 : vector<8x32xf32>
    %219 = arith.mulf %218, %218 : vector<8x32xf32>
    %cst_77 = arith.constant dense<0.000000e+00> : vector<8xf32>
    %220 = vector.multi_reduction <add>, %219, %cst_77 [1] : vector<8x32xf32> to vector<8xf32>
    %221 = vector.shape_cast %220 : vector<8xf32> to vector<8x1xf32>
    %cst_78 = arith.constant 3.200000e+01 : f32
    %222 = vector.broadcast %cst_78 : f32 to vector<8x1xf32>
    %223 = arith.divf %221, %222 : vector<8x1xf32>
    %224 = vector.broadcast %216 : vector<8x1xf32> to vector<8x32xf32>
    %225 = arith.subf %212, %224 : vector<8x32xf32>
    %cst_79 = arith.constant 9.99999996E-13 : f32
    %226 = vector.broadcast %cst_79 : f32 to vector<8x1xf32>
    %227 = arith.addf %223, %226 : vector<8x1xf32>
    %228 = math.rsqrt %227 : vector<8x1xf32>
    %229 = vector.broadcast %228 : vector<8x1xf32> to vector<8x32xf32>
    %230 = arith.mulf %225, %229 : vector<8x32xf32>
    %231 = vector.shape_cast %10 : vector<32xf32> to vector<1x32xf32>
    %232 = vector.broadcast %231 : vector<1x32xf32> to vector<8x32xf32>
    %233 = arith.mulf %230, %232 : vector<8x32xf32>
    %234 = vector.shape_cast %12 : vector<32xf32> to vector<1x32xf32>
    %235 = vector.broadcast %234 : vector<1x32xf32> to vector<8x32xf32>
    %236 = arith.addf %233, %235 : vector<8x32xf32>
    %cst_80 = arith.constant dense<0.000000e+00> : vector<8x64xf32>
    %237 = tpu.matmul %236, %13, %cst_80 {dimension_numbers = #tpu.dot_dimension_numbers<[1], [0], [0], [1], [0, 0, 1, 1], [], []>} : vector<8x32xf32>, vector<32x64xf32>, vector<8x64xf32> -> vector<8x64xf32>
    %238 = vector.shape_cast %15 : vector<64xf32> to vector<1x64xf32>
    %239 = vector.broadcast %238 : vector<1x64xf32> to vector<8x64xf32>
    %240 = arith.addf %237, %239 : vector<8x64xf32>
    %cst_81 = arith.constant 0.000000e+00 : f32
    %241 = vector.broadcast %cst_81 : f32 to vector<8x64xf32>
    %242 = arith.maximumf %240, %241 : vector<8x64xf32>
    %cst_82 = arith.constant dense<0.000000e+00> : vector<8x32xf32>
    %243 = tpu.matmul %242, %16, %cst_82 {dimension_numbers = #tpu.dot_dimension_numbers<[1], [0], [0], [1], [0, 0, 1, 1], [], []>} : vector<8x64xf32>, vector<64x32xf32>, vector<8x32xf32> -> vector<8x32xf32>
    %244 = vector.shape_cast %18 : vector<32xf32> to vector<1x32xf32>
    %245 = vector.broadcast %244 : vector<1x32xf32> to vector<8x32xf32>
    %246 = arith.addf %243, %245 : vector<8x32xf32>
    %247 = arith.addf %212, %246 : vector<8x32xf32>
    %c1_83 = arith.constant 1 : index
    %c0_84 = arith.constant 0 : index
    %c0_85 = arith.constant 0 : index
    %248 = vector.load %arg15[%c1_83, %c0_84, %c0_85] : memref<2x8x32xf32, #tpu.memory_space<vmem>>, vector<1x8x32xf32>
    %249 = vector.shape_cast %248 : vector<1x8x32xf32> to vector<8x32xf32>
    %250 = vector.shape_cast %247 : vector<8x32xf32> to vector<1x8x32xf32>
    tpu.vector_store %arg15[%c1_83, %c0_84, %c0_85], %250 {strides = array<i32>} : memref<2x8x32xf32, #tpu.memory_space<vmem>>, vector<1x8x32xf32>,
    return
  }
  func.func @transform_0(%arg0: i32) -> (i32, i32, i32) {
    %c0_i32 = arith.constant 0 : i32
    %c0_i32_0 = arith.constant 0 : i32
    %c0_i32_1 = arith.constant 0 : i32
    return %arg0, %c0_i32, %c0_i32_0 : i32, i32, i32
  }
  func.func @transform_1(%arg0: i32) -> (i32, i32, i32) {
    %c0_i32 = arith.constant 0 : i32
    %c0_i32_0 = arith.constant 0 : i32
    %c0_i32_1 = arith.constant 0 : i32
    return %arg0, %c0_i32, %c0_i32_0 : i32, i32, i32
  }
  func.func @transform_2(%arg0: i32) -> (i32, i32) {
    %c0_i32 = arith.constant 0 : i32
    %c0_i32_0 = arith.constant 0 : i32
    %c0_i32_1 = arith.constant 0 : i32
    return %c0_i32, %c0_i32_0 : i32, i32
  }
  func.func @transform_3(%arg0: i32) -> (i32, i32) {
    %c0_i32 = arith.constant 0 : i32
    %c0_i32_0 = arith.constant 0 : i32
    %c0_i32_1 = arith.constant 0 : i32
    return %c0_i32, %c0_i32_0 : i32, i32
  }
  func.func @transform_4(%arg0: i32) -> (i32, i32, i32) {
    %c0_i32 = arith.constant 0 : i32
    %c0_i32_0 = arith.constant 0 : i32
    %c0_i32_1 = arith.constant 0 : i32
    %c0_i32_2 = arith.constant 0 : i32
    return %c0_i32, %c0_i32_0, %c0_i32_1 : i32, i32, i32
  }
  func.func @transform_5(%arg0: i32) -> (i32, i32, i32) {
    %c0_i32 = arith.constant 0 : i32
    %c0_i32_0 = arith.constant 0 : i32
    %c0_i32_1 = arith.constant 0 : i32
    %c0_i32_2 = arith.constant 0 : i32
    return %c0_i32, %c0_i32_0, %c0_i32_1 : i32, i32, i32
  }
  func.func @transform_6(%arg0: i32) -> (i32, i32, i32) {
    %c0_i32 = arith.constant 0 : i32
    %c0_i32_0 = arith.constant 0 : i32
    %c0_i32_1 = arith.constant 0 : i32
    %c0_i32_2 = arith.constant 0 : i32
    return %c0_i32, %c0_i32_0, %c0_i32_1 : i32, i32, i32
  }
  func.func @transform_7(%arg0: i32) -> (i32, i32) {
    %c0_i32 = arith.constant 0 : i32
    %c0_i32_0 = arith.constant 0 : i32
    %c0_i32_1 = arith.constant 0 : i32
    return %c0_i32, %c0_i32_0 : i32, i32
  }
  func.func @transform_8(%arg0: i32) -> (i32, i32) {
    %c0_i32 = arith.constant 0 : i32
    %c0_i32_0 = arith.constant 0 : i32
    %c0_i32_1 = arith.constant 0 : i32
    return %c0_i32, %c0_i32_0 : i32, i32
  }
  func.func @transform_9(%arg0: i32) -> (i32, i32) {
    %c0_i32 = arith.constant 0 : i32
    %c0_i32_0 = arith.constant 0 : i32
    %c0_i32_1 = arith.constant 0 : i32
    return %c0_i32, %c0_i32_0 : i32, i32
  }
  func.func @transform_10(%arg0: i32) -> (i32, i32) {
    %c0_i32 = arith.constant 0 : i32
    %c0_i32_0 = arith.constant 0 : i32
    %c0_i32_1 = arith.constant 0 : i32
    return %c0_i32, %c0_i32_0 : i32, i32
  }
  func.func @transform_11(%arg0: i32) -> (i32, i32) {
    %c0_i32 = arith.constant 0 : i32
    %c0_i32_0 = arith.constant 0 : i32
    %c0_i32_1 = arith.constant 0 : i32
    return %c0_i32, %c0_i32_0 : i32, i32
  }
  func.func @transform_12(%arg0: i32) -> (i32, i32) {
    %c0_i32 = arith.constant 0 : i32
    %c0_i32_0 = arith.constant 0 : i32
    %c0_i32_1 = arith.constant 0 : i32
    return %c0_i32, %c0_i32_0 : i32, i32
  }
  func.func @transform_13(%arg0: i32) -> (i32, i32) {
    %c0_i32 = arith.constant 0 : i32
    %c0_i32_0 = arith.constant 0 : i32
    %c0_i32_1 = arith.constant 0 : i32
    return %c0_i32, %c0_i32_0 : i32, i32
  }
  func.func @transform_14(%arg0: i32) -> (i32, i32, i32) {
    %c0_i32 = arith.constant 0 : i32
    %c0_i32_0 = arith.constant 0 : i32
    %c0_i32_1 = arith.constant 0 : i32
    return %arg0, %c0_i32, %c0_i32_0 : i32, i32, i32
  }
}

</mosaic_0001>

<bundles_post_ra>
// kernel: encoder_layer.1
= control target key start
LH: loop header
LB: loop body
LE: loop exit
PB: predicated region body
PF: predicated region fallthrough
CT: control target
= control target key end

     0   :  { %vm97_vm0 = vcmask 261120   ;;  %s1942_s0 = inlined_call_operand.vmem [shape: f32[2,8,32], index: 0, kind: input, shape index: {}]   ;;  %s1943_s1 = inlined_call_operand.vmem [shape: f32[2,1,8], index: 1, kind: input, shape index: {}]   ;;  %s1944_s2 = inlined_call_operand.vmem [shape: f32[1,32], index: 2, kind: input, shape index: {}]   ;;  %s1945_s3 = inlined_call_operand.vmem [shape: f32[1,32], index: 3, kind: input, shape index: {}]   ;;  %s1946_s4 = inlined_call_operand.vmem [shape: f32[4,32,24], index: 4, kind: input, shape index: {}]   ;;  %s1947_s5 = inlined_call_operand.vmem [shape: f32[4,1,24], index: 5, kind: input, shape index: {}]   ;;  %s1948_s6 = inlined_call_operand.vmem [shape: f32[4,8,32], index: 6, kind: input, shape index: {}]   ;;  %s1949_s7 = inlined_call_operand.vmem [shape: f32[1,32], index: 7, kind: input, shape index: {}]   ;;  %s1950_s8 = inlined_call_operand.vmem [shape: f32[1,32], index: 8, kind: input, shape index: {}]   ;;  %s1951_s9 = inlined_call_operand.vmem [shape: f32[1,32], index: 9, kind: input, shape index: {}]   ;;  %s1952_s10 = inlined_call_operand.vmem [shape: f32[32,64], index: 10, kind: input, shape index: {}]   ;;  %s1953_s11 = inlined_call_operand.vmem [shape: f32[1,64], index: 11, kind: input, shape index: {}]   ;;  %s1954_s12 = inlined_call_operand.vmem [shape: f32[64,32], index: 12, kind: input, shape index: {}]   ;;  %s1955_s13 = inlined_call_operand.vmem [shape: f32[1,32], index: 13, kind: input, shape index: {}]   ;;  %s1956_s14 = inlined_call_operand.hbm [shape: f32[2,8,32], index: 14, kind: output, shape index: {}]  }
   0x1   :  { %v1494_v0 = vld [vmem:[%s1942_s0] sm:$0xff] }
   0x2   :  { %v98_v1 = vsel %vm97_vm0, %v1494_v0, 0.0 }
   0x3   :  { %99 = vadd.xlane.f32.xlu0 %v98_v1 }
   0x4   :  { %19 = vsyncpa [#allocation3], 0  ;;  %v1408_v2 = vmov 32.0   ;;  %v1506_v14 = vld [vmem:[%s1946_s4 + $0x18] sm:$0xff]  ;;  %v1524_v17 = vld [vmem:[%s1946_s4 + $0x10] sm:$0xff]  ;;  %vm236_vm5 = vcmask 64512  }
   0x5   :  { %1340 = vrcp.f32 %v1408_v2  ;;  %v1511_v15 = vld [vmem:[%s1946_s4 + $0x58] sm:$0xff]  ;;  %162 = vmatpush.msra.mxu1 %v1506_v14  ;;  %v1529_v18 = vld [vmem:[%s1946_s4 + $0x50] sm:$0xff]  ;;  %v1541_v20 = vld [vmem:[%s1946_s4 + $0x8] sm:$0xff]  ;;  %v1410_v62 = vmov -1e+30   ;;  %s1411_s26 = smov 112  }
   0x6   :  { %v1516_v16 = vld [vmem:[%s1946_s4 + $0x78] sm:$0xff]  ;;  %202 = vmatpush.msra.mxu2 %v1511_v15  ;;  %v1534_v19 = vld [vmem:[%s1946_s4 + $0x70] sm:$0xff]  ;;  %v1546_v21 = vld [vmem:[%s1946_s4 + $0x48] sm:$0xff]  ;;  %vm657_vm13 = vcmask 523264   ;;  %s1414_s25 = smov 128   ;;  %s1415_s27 = smov 8  }
   0x7   :  { %222 = vmatpush.msra.mxu3 %v1516_v16  ;;  %163 = vmatpush.msra.mxu1 %v1524_v17  ;;  %v1551_v22 = vld [vmem:[%s1946_s4 + $0x68] sm:$0xff]  ;;  %v1557_v23 = vld [vmem:[%s1946_s4] sm:$0xff]  ;;  %v1578_v26 = vld [vmem:[%s1946_s4 + $0x38] sm:$0xff] }
   0x8   :  { %203 = vmatpush.msra.mxu2 %v1529_v18  ;;  %v1562_v24 = vld [vmem:[%s1946_s4 + $0x40] sm:$0xff]  ;;  %v1583_v27 = vld [vmem:[%s1946_s4 + $0x30] sm:$0xff]  ;;  %v1589_v29 = vld [vmem:[%s1946_s4 + $0x28] sm:$0xff] }
   0x9   :  { %223 = vmatpush.msra.mxu3 %v1534_v19  ;;  %164 = vmatpush.msra.mxu1 %v1541_v20  ;;  %v1569_v25 = vld [vmem:[%s1946_s4 + $0x60] sm:$0xff] }
   0xa   :  { %204 = vmatpush.msra.mxu2 %v1546_v21  ;;  %v1596_v31 = vld [vmem:[%s1946_s4 + $0x20] sm:$0xff] }
   0xb   :  { %v1341_v3 = vpop.eup %1340  ;;  %224 = vmatpush.msra.mxu3 %v1551_v22  ;;  %165 = vmatpush.msra.mxu1 %v1557_v23  ;;  %v1603_v39 = vld [vmem:[%s1944_s2] ss:$0 sm:$0xff]  ;;  %v1626_v48 = vld [vmem:[%s1947_s5 + $0x2] ss:$0 sm:$0xff]  ;;  %v1631_v49 = vld [vmem:[%s1947_s5 + $0x1] ss:$0 sm:$0xff] }
   0xc   :  { %v102_v4 = vmul.f32 32.0, %v1341_v3  ;;  %vm106_vm1 = vweird.f32 %v1341_v3  ;;  %205 = vmatpush.msra.mxu2 %v1562_v24  ;;  %v1608_v42 = vld [vmem:[%s1945_s3] ss:$0 sm:$0xff]  ;;  %s1409_s3 = smov 120   ;;  %v1639_v54 = vld [vmem:[%s1947_s5 + $0x3] ss:$0 sm:$0xff] }
   0xd   :  { %225 = vmatpush.msra.mxu3 %v1569_v25  ;;  %182 = vmatpush.msrb.mxu1 %v1578_v26  ;;  %v1619_v45 = vld [vmem:[%s1947_s5] ss:$0 sm:$0xff] }
   0xe   :  { %v103_v5 = vsub.f32 1.0, %v102_v4  ;;  %v1655_v61 = vld [vmem:[%s1943_s1] sm:$0x1] }
   0xf   :  { %183 = vmatpush.msrb.mxu1 %v1583_v27  ;;  %vm93_vm6 = vcmp.gt.f32.partialorder %v1655_v61, 0.0 }
  0x10   :  { %v104_v6 = vmul.f32 %v1341_v3, %v103_v5  ;;  %v96_v63 = vsel %vm93_vm6, 0.0, %v1410_v62 }
  0x11   :  { %184 = vmatpush.msrb.mxu1 %v1589_v29  ;;  %v231_v1 = vperm.slane %v96_v63, 0 }
  0x12   :  { %v105_v7 = vadd.f32 %v1341_v3, %v104_v6 }
  0x13   :  { %185 = vmatpush.msrb.mxu1 %v1596_v31 }
  0x14   :  { %v1498_v8 = vsel %vm106_vm1, %v1341_v3, %v105_v7 }
  0x76   :  { %v100_v9 = vpop.xlane.xlu0 %99 }
  0x77   :  { %v108_v10 = vmul.f32 %v1498_v8, %v100_v9 }
  0x79   :  { %v109_v11 = vsub.f32 %v1494_v0, %v108_v10 }
  0x7b   :  { %v110_v12 = vmul.f32 %v109_v11, %v109_v11 }
  0x7d   :  { %v111_v13 = vsel %vm97_vm0, %v110_v12, 0.0 }
  0x7e   :  { %112 = vadd.xlane.f32.xlu0 %v111_v13 }
  0xf1   :  { %v113_v28 = vpop.xlane.xlu0 %112 }
  0xf2   :  { %v114_v30 = vmul.f32 %v113_v28, %v1498_v8 }
  0xf4   :  { %v115_v32 = vadd.f32 1e-12, %v114_v30 }
  0xf6   :  { %1342 = vrsqrt.f32 %v115_v32  ;;  %vm122_vm3 = vweird.f32 %v115_v32 }
  0xfc   :  { %v1343_v33 = vpop.eup %1342 }
  0xfd   :  { %v117_v34 = vmul.f32 %v1343_v33, %v115_v32  ;;  %vm123_vm2 = vweird.f32 %v1343_v33 }
  0xfe   :  { %vm124_vm4 = vmor %vm122_vm3, %vm123_vm2 }
  0xff   :  { %v118_v35 = vmul.f32 %v1343_v33, %v117_v34 }
 0x101   :  { %v119_v36 = vmul.f32 0.5, %v118_v35 }
 0x103   :  { %v120_v37 = vsub.f32 1.5, %v119_v36 }
 0x105   :  { %v121_v38 = vmul.f32 %v1343_v33, %v120_v37 }
 0x107   :  { %v125_v40 = vsel %vm124_vm4, %v1343_v33, %v121_v38 }
 0x108   :  { %v126_v41 = vmul.f32 %v125_v40, %v109_v11 }
 0x10a   :  { %v130_v43 = vmul.f32 %v1603_v39, %v126_v41 }
 0x10c   :  { %v134_v44 = vadd.f32 %v1608_v42, %v130_v43 }
 0x10e   :  { %1254 = vmatmul.msk.f32.vlgmr.msra.gmra.mxu1 %vm97_vm0, %v134_v44  ;;  %1256 = vmatmul.msk.f32.vlgmr.msra.gmra.mxu2 %vm97_vm0, %v134_v44 }
 0x10f   :  { %1257 = vmatmul.msk.f32.vlgmr.msra.gmra.mxu3 %vm97_vm0, %v134_v44 }
 0x116   :  { %1255 = vmatmul.msk.f32.vlgmr.msrb.gmra.mxu1 %vm97_vm0, %v134_v44 }
 0x18b   :  { %v167_v46 = vpop.f32.mrf.mxu1 }
 0x18c   :  { %v168_v47 = vadd.f32 %v1619_v45, %v167_v46 }
 0x18e   :  { %234 = vrot.lane.b32.xlu2 %v168_v47, %s1409_s3 }
 0x191   :  { %v207_v50 = vpop.f32.mrf.mxu2 }
 0x192   :  { %v208_v51 = vadd.f32 %v1626_v48, %v207_v50  ;;  %v227_v55 = vpop.f32.mrf.mxu3 }
 0x193   :  { %v187_v52 = vpop.f32.mrf.mxu1  ;;  %v228_v56 = vadd.f32 %v1639_v54, %v227_v55 }
 0x194   :  { %v188_v53 = vadd.f32 %v1631_v49, %v187_v52  ;;  %289 = vrot.lane.b32.xlu1 %v208_v51, %s1409_s3 }
 0x195   :  { %v1309_v5 = vpack.i.bf16 %v228_v56, %v208_v51 }
 0x196   :  { %262 = vrot.lane.b32.xlu2 %v188_v53, %s1409_s3  ;;  %v1314_v32 = vpack.i.bf16 %v188_v53, %v168_v47 }
 0x19c   :  { %316 = vrot.lane.b32.xlu1 %v228_v56, %s1409_s3 }
 0x1e8   :  { %v235_v57 = vpop.permute.xlu2 %234 }
 0x1e9   :  { %1258 = vmatpush.xpose.msk.msra.mxu0 %vm236_vm5, %v235_v57 }
 0x1ec   :  { %1259 = vmatmul.msk.f32.vlgmr.msra.gmra.mxu0 %vm236_vm5, %v168_v47 }
 0x1f0   :  { %v263_v58 = vpop.permute.xlu2 %262 }
 0x1f1   :  { %1260 = vmatpush.xpose.msk.msra.mxu1 %vm236_vm5, %v263_v58 }
 0x1f4   :  { %1261 = vmatmul.msk.f32.vlgmr.msra.gmra.mxu1 %vm236_vm5, %v188_v53 }
 0x206   :  { %v290_v59 = vpop.permute.xlu1 %289 }
 0x207   :  { %1262 = vmatpush.xpose.msk.msrb.mxu2 %vm236_vm5, %v290_v59 }
 0x20a   :  { %1263 = vmatmul.msk.f32.vlgmr.msrb.gmra.mxu2 %vm236_vm5, %v208_v51 }
 0x20e   :  { %v317_v60 = vpop.permute.xlu1 %316 }
 0x20f   :  { %1264 = vmatpush.xpose.msk.msrb.mxu3 %vm236_vm5, %v317_v60 }
 0x212   :  { %1265 = vmatmul.msk.f32.vlgmr.msrb.gmra.mxu3 %vm236_vm5, %v228_v56 }
 0x269   :  { %v258_v2 = vpop.f32.mrf.mxu0 }
 0x26a   :  { %v259_v3 = vadd.f32 %v258_v2, %v231_v1 }
 0x26c   :  { %v342_v4 = vsel %vm236_vm5, %v259_v3, -inf }
 0x26d   :  { %343 = vmax.xlane.f32.xlu2 %v342_v4 }
 0x271   :  { %v285_v10 = vpop.f32.mrf.mxu1 }
 0x272   :  { %v286_v11 = vadd.f32 %v285_v10, %v231_v1 }
 0x274   :  { %v345_v30 = vsel %vm236_vm5, %v286_v11, -inf }
 0x285   :  { %1310 = vrot.lane.b32.xlu2 %v1309_v5, %s1411_s26  ;;  %v1412_v5 = vmov 0.0  }
 0x28d   :  { %v312_v6 = vpop.f32.mrf.mxu2 }
 0x28e   :  { %v313_v7 = vadd.f32 %v312_v6, %v231_v1  ;;  %v1253_v6 = vsel %vm93_vm6, 1.0, %v1412_v5 }
 0x290   :  { %v348_v9 = vsel %vm236_vm5, %v313_v7, -inf }
 0x291   :  { %349 = vmax.xlane.f32.xlu0 %v348_v9 }
 0x295   :  { %v339_v12 = vpop.f32.mrf.mxu3 }
 0x296   :  { %v340_v13 = vadd.f32 %v339_v12, %v231_v1 }
 0x298   :  { %v351_v28 = vsel %vm236_vm5, %v340_v13, -inf }
 0x299   :  { %352 = vmax.xlane.f32.xlu1 %v351_v28  ;;  %346 = vmax.xlane.f32.xlu0 %v345_v30 }
 0x2b2   :  { %1315 = vrot.lane.b32.xlu1 %v1314_v32, %s1411_s26 }
 0x2e0   :  { %v344_v33 = vpop.xlane.xlu2 %343 }
 0x2e1   :  { %v354_v34 = vsub.f32 %v259_v3, %v344_v33 }
 0x2e3   :  { %v358_v35 = vmul.f32 1.442695, %v354_v34 }
 0x2e5   :  { %1344 = vpow2.f32 %v358_v35 }
 0x2e8   :  { %v1311_v36 = vpop.permute.xlu2 %1310 }
 0x2e9   :  { %v1313_v37 = vunpack.i.h.bf16 %v1311_v36  ;;  %v1312_v38 = vunpack.i.l.bf16 %v1311_v36 }
 0x2eb   :  { %v1345_v40 = vpop.eup %1344  ;;  %466 = vmatpush.msra.mxu2 %v1312_v38  ;;  %492 = vmatpush.msra.mxu3 %v1313_v37 }
 0x2ec   :  { %v366_v41 = vsel %vm236_vm5, %v1345_v40, 0.0 }
 0x2ed   :  { %367 = vadd.xlane.f32.xlu0 %v366_v41 }
 0x304   :  { %v350_v43 = vpop.xlane.xlu0 %349 }
 0x305   :  { %v356_v44 = vsub.f32 %v313_v7, %v350_v43  ;;  %v387_v7 = vperm.slane %v1253_v6, 0  ;;  %v1688_v43 = vld [vmem:[%s1948_s6 + $0x10] sm:$0xff] }
 0x306   :  { %561 = vmatpush.msrb.mxu2 %v1688_v43 }
 0x307   :  { %v362_v46 = vmul.f32 1.442695, %v356_v44  ;;  %v1694_v44 = vld [vmem:[%s1948_s6 + $0x18] sm:$0xff] }
 0x308   :  { %584 = vmatpush.msrb.mxu3 %v1694_v44 }
 0x309   :  { %1346 = vpow2.f32 %v362_v46  ;;  %v1706_v46 = vld [vmem:[%s1948_s6 + $0x8] sm:$0xff] }
 0x30c   :  { %v353_v47 = vpop.xlane.xlu1 %352  ;;  %v347_v50 = vpop.xlane.xlu0 %346 }
 0x30d   :  { %v357_v51 = vsub.f32 %v340_v13, %v353_v47  ;;  %v355_v55 = vsub.f32 %v286_v11, %v347_v50 }
 0x30f   :  { %v1347_v52 = vpop.eup %1346  ;;  %v364_v53 = vmul.f32 1.442695, %v357_v51  ;;  %v360_v57 = vmul.f32 1.442695, %v355_v55 }
 0x310   :  { %v372_v56 = vsel %vm236_vm5, %v1347_v52, 0.0 }
 0x311   :  { %1348 = vpow2.f32 %v364_v53  ;;  %373 = vadd.xlane.f32.xlu0 %v372_v56 }
 0x312   :  { %1350 = vpow2.f32 %v360_v57 }
 0x317   :  { %v1349_v58 = vpop.eup %1348 }
 0x318   :  { %v375_v59 = vsel %vm236_vm5, %v1349_v58, 0.0  ;;  %v1351_v60 = vpop.eup %1350 }
 0x319   :  { %376 = vadd.xlane.f32.xlu0 %v375_v59  ;;  %v369_v63 = vsel %vm236_vm5, %v1351_v60, 0.0 }
 0x321   :  { %370 = vadd.xlane.f32.xlu0 %v369_v63 }
 0x324   :  { %v1316_v1 = vpop.permute.xlu1 %1315 }
 0x325   :  { %v1318_v2 = vunpack.i.h.bf16 %v1316_v1  ;;  %v1317_v3 = vunpack.i.l.bf16 %v1316_v1 }
 0x327   :  { %414 = vmatpush.msrb.mxu0 %v1317_v3  ;;  %440 = vmatpush.msrb.mxu1 %v1318_v2 }
 0x329   :  { %538 = vmatpush.msra.mxu1 %v1706_v46 }
 0x360   :  { %v368_v4 = vpop.xlane.xlu0 %367 }
 0x361   :  { %1352 = vrcp.f32 %v368_v4 }
 0x367   :  { %v1353_v9 = vpop.eup %1352 }
 0x368   :  { %v382_v10 = vmul.f32 %v1353_v9, %v1345_v40  ;;  %v1681_v40 = vld [vmem:[%s1948_s6] sm:$0xff] }
 0x369   :  { %515 = vmatpush.msra.mxu0 %v1681_v40 }
 0x36a   :  { %v389_v11 = vmul.f32 %v387_v7, %v382_v10 }
 0x36c   :  { %1266 = vmatmul.msk.f32.vlgmr.msrb.gmra.mxu0 %vm236_vm5, %v389_v11 }
 0x384   :  { %v374_v12 = vpop.xlane.xlu0 %373 }
 0x385   :  { %1354 = vrcp.f32 %v374_v12 }
 0x38b   :  { %v1355_v13 = vpop.eup %1354 }
 0x38c   :  { %v384_v28 = vmul.f32 %v1355_v13, %v1347_v52  ;;  %v377_v30 = vpop.xlane.xlu0 %376 }
 0x38d   :  { %1356 = vrcp.f32 %v377_v30 }
 0x38e   :  { %v391_v32 = vmul.f32 %v387_v7, %v384_v28 }
 0x390   :  { %1268 = vmatmul.msk.f32.vlgmr.msra.gmra.mxu2 %vm236_vm5, %v391_v32 }
 0x391   :  { %730 = vmatpush.msra.mxu2 %v1506_v14  ;;  %v1714_v14 = vld [vmem:[%s1942_s0 + $0x8] sm:$0xff] }
 0x393   :  { %v1357_v33 = vpop.eup %1356  ;;  %731 = vmatpush.msra.mxu2 %v1524_v17  ;;  %v691_v17 = vsel %vm97_vm0, %v1714_v14, 0.0 }
 0x394   :  { %v385_v34 = vmul.f32 %v1357_v33, %v1349_v58  ;;  %v371_v35 = vpop.xlane.xlu0 %370  ;;  %692 = vadd.xlane.f32.xlu0 %v691_v17  ;;  %v1751_v33 = vld [vmem:[%s1952_s10 + $0x18] sm:$0xff] }
 0x395   :  { %1358 = vrcp.f32 %v371_v35  ;;  %732 = vmatpush.msra.mxu2 %v1541_v20  ;;  %645 = vmatpush.msrb.mxu0 %v1751_v33 }
 0x396   :  { %v392_v61 = vmul.f32 %v387_v7, %v385_v34  ;;  %v1757_v34 = vld [vmem:[%s1952_s10 + $0x10] sm:$0xff] }
 0x397   :  { %733 = vmatpush.msra.mxu2 %v1557_v23  ;;  %646 = vmatpush.msrb.mxu0 %v1757_v34 }
 0x398   :  { %1269 = vmatmul.msk.f32.vlgmr.msra.gmra.mxu3 %vm236_vm5, %v392_v61 }
 0x399   :  { %750 = vmatpush.msra.mxu3 %v1578_v26 }
 0x39b   :  { %v1359_v36 = vpop.eup %1358  ;;  %751 = vmatpush.msra.mxu3 %v1583_v27 }
 0x39c   :  { %v383_v37 = vmul.f32 %v1359_v36, %v1351_v60 }
 0x39d   :  { %752 = vmatpush.msra.mxu3 %v1589_v29 }
 0x39e   :  { %v390_v38 = vmul.f32 %v387_v7, %v383_v37 }
 0x39f   :  { %753 = vmatpush.msra.mxu3 %v1596_v31 }
 0x3a0   :  { %1267 = vmatmul.msk.f32.vlgmr.msrb.gmra.mxu1 %vm236_vm5, %v390_v38 }
 0x3e9   :  { %v416_v41 = vpop.f32.mrf.mxu0 }
 0x3ea   :  { %1270 = vmatmul.msk.f32.vlgmr.msra.gmra.mxu0 %vm236_vm5, %v416_v41 }
 0x407   :  { %v693_v50 = vpop.xlane.xlu0 %692 }
 0x413   :  { %v468_v20 = vpop.f32.mrf.mxu2 }
 0x414   :  { %1272 = vmatmul.msk.f32.vlgmr.msrb.gmra.mxu2 %vm236_vm5, %v468_v20 }
 0x415   :  { %790 = vmatpush.msrb.mxu2 %v1516_v16 }
 0x417   :  { %791 = vmatpush.msrb.mxu2 %v1534_v19  ;;  %v1728_v19 = vld [vmem:[%s1949_s7] ss:$0 sm:$0xff] }
 0x419   :  { %792 = vmatpush.msrb.mxu2 %v1551_v22  ;;  %v694_v22 = vmul.f32 %v693_v50, %v1498_v8  ;;  %v1809_v50 = vld [vmem:[%s1954_s12 + $0x20] sm:$0xff] }
 0x41b   :  { %v494_v23 = vpop.f32.mrf.mxu3  ;;  %793 = vmatpush.msrb.mxu2 %v1569_v25  ;;  %v695_v55 = vsub.f32 %v1714_v14, %v694_v22 }
 0x41c   :  { %1273 = vmatmul.msk.f32.vlgmr.msrb.gmra.mxu3 %vm236_vm5, %v494_v23 }
 0x41d   :  { %v442_v26 = vpop.f32.mrf.mxu1  ;;  %v696_v57 = vmul.f32 %v695_v55, %v695_v55 }
 0x41e   :  { %1271 = vmatmul.msk.f32.vlgmr.msra.gmra.mxu1 %vm236_vm5, %v442_v26  ;;  %v1790_v26 = vld [vmem:[%s1954_s12 + $0x38] sm:$0xff] }
 0x41f   :  { %v697_v58 = vsel %vm97_vm0, %v696_v57, 0.0  ;;  %669 = vmatpush.msrb.mxu1 %v1790_v26  ;;  %v1833_v57 = vld [vmem:[%s1954_s12 + $0x10] sm:$0xff] }
 0x467   :  { %v517_v27 = vpop.f32.mrf.mxu0 }
 0x497   :  { %v563_v47 = vpop.f32.mrf.mxu2 }
 0x49b   :  { %v540_v29 = vpop.f32.mrf.mxu1 }
 0x49c   :  { %v589_v31 = vadd.f32 %v540_v29, %v517_v27  ;;  %v1795_v27 = vld [vmem:[%s1954_s12 + $0x30] sm:$0xff] }
 0x49d   :  { %670 = vmatpush.msrb.mxu1 %v1795_v27 }
 0x49e   :  { %v590_v51 = vadd.f32 %v589_v31, %v563_v47  ;;  %v1802_v31 = vld [vmem:[%s1954_s12 + $0x28] sm:$0xff] }
 0x49f   :  { %v586_v52 = vpop.f32.mrf.mxu3  ;;  %671 = vmatpush.msrb.mxu1 %v1802_v31 }
 0x4a0   :  { %v591_v16 = vadd.f32 %v590_v51, %v586_v52  ;;  %v1816_v51 = vld [vmem:[%s1954_s12 + $0x18] sm:$0xff] }
 0x4a1   :  { %672 = vmatpush.msrb.mxu1 %v1809_v50 }
 0x4a2   :  { %v592_v25 = vadd.f32 %v591_v16, %v1494_v0 }
 0x4a3   :  { %673 = vmatpush.msrb.mxu1 %v1816_v51 }
 0x4a4   :  { %v1733_v53 = vadd.f32 %v1728_v19, %v592_v25 }
 0x4a5   :  { %674 = vmatpush.msrb.mxu1 %v1833_v57 }
 0x4a6   :  { %v597_v56 = vsel %vm97_vm0, %v1733_v53, 0.0 }
 0x4a7   :  { %598 = vadd.xlane.f32.xlu0 %v597_v56 }
 0x4af   :  { %698 = vadd.xlane.f32.xlu0 %v697_v58 }
 0x51a   :  { %v599_v59 = vpop.xlane.xlu0 %598 }
 0x51b   :  { %v600_v60 = vmul.f32 %v599_v59, %v1498_v8 }
 0x51d   :  { %v601_v63 = vsub.f32 %v1733_v53, %v600_v60 }
 0x51f   :  { %v602_v1 = vmul.f32 %v601_v63, %v601_v63 }
 0x521   :  { %v603_v0 = vsel %vm97_vm0, %v602_v1, 0.0 }
 0x522   :  { %604 = vadd.xlane.f32.xlu2 %v603_v0  ;;  %v699_v2 = vpop.xlane.xlu0 %698 }
 0x523   :  { %v700_v3 = vmul.f32 %v699_v2, %v1498_v8 }
 0x525   :  { %v701_v4 = vadd.f32 1e-12, %v700_v3 }
 0x527   :  { %1360 = vrsqrt.f32 %v701_v4  ;;  %vm708_vm7 = vweird.f32 %v701_v4 }
 0x52d   :  { %v1361_v6 = vpop.eup %1360 }
 0x52e   :  { %v703_v7 = vmul.f32 %v1361_v6, %v701_v4  ;;  %vm709_vm8 = vweird.f32 %v1361_v6  ;;  %v1871_v4 = vld [vmem:[%s1955_s13] ss:$0 sm:$0xff] }
 0x52f   :  { %vm710_vm9 = vmor %vm708_vm7, %vm709_vm8 }
 0x530   :  { %v704_v9 = vmul.f32 %v1361_v6, %v703_v7 }
 0x532   :  { %v705_v10 = vmul.f32 0.5, %v704_v9  ;;  %v1879_v9 = vld [vmem:[%s1943_s1 + $0x1] sm:$0x1]  ;;  %s1413_s1 = smov [#allocation2]  }
 0x533   :  { %vm687_vm14 = vcmp.gt.f32.partialorder %v1879_v9, 0.0  ;;  %s1239_s13 = sshll.u32 %s1413_s1, 4  ;;  %s1240_s13 = int_to_ptr.vmem [resolvable:$true] %s1239_s13 }
 0x534   :  { %v706_v11 = vsub.f32 1.5, %v705_v10 }
 0x536   :  { %v707_v12 = vmul.f32 %v1361_v6, %v706_v11  ;;  %v690_v11 = vsel %vm687_vm14, 0.0, %v1410_v62 }
 0x538   :  { %v711_v13 = vsel %vm710_vm9, %v1361_v6, %v707_v12  ;;  %v799_v12 = vperm.slane %v690_v11, 0 }
 0x539   :  { %v712_v28 = vmul.f32 %v711_v13, %v695_v55 }
 0x53b   :  { %v713_v30 = vmul.f32 %v1603_v39, %v712_v28  ;;  %v1763_v39 = vld [vmem:[%s1952_s10 + $0x8] sm:$0xff] }
 0x53c   :  { %647 = vmatpush.msrb.mxu0 %v1763_v39 }
 0x53d   :  { %v714_v32 = vadd.f32 %v1608_v42, %v713_v30  ;;  %v1768_v42 = vld [vmem:[%s1952_s10] sm:$0xff]  ;;  %s1241_s10 = sshll.u32 %s1956_s14, 4  ;;  %s1242_s10 = int_to_ptr.hbm [resolvable:$true] %s1241_s10 }
 0x53e   :  { %648 = vmatpush.msrb.mxu0 %v1768_v42 }
 0x53f   :  { %1279 = vmatmul.msk.f32.vlgmr.msra.gmra.mxu2 %vm97_vm0, %v714_v32  ;;  %1280 = vmatmul.msk.f32.vlgmr.msra.gmra.mxu3 %vm97_vm0, %v714_v32 }
 0x540   :  { %770 = vmatpush.msra.mxu0 %v1511_v15  ;;  %v1780_v15 = vld [vmem:[%s1950_s8] ss:$0 sm:$0xff] }
 0x542   :  { %771 = vmatpush.msra.mxu0 %v1529_v18 }
 0x544   :  { %772 = vmatpush.msra.mxu0 %v1546_v21 }
 0x546   :  { %773 = vmatpush.msra.mxu0 %v1562_v24  ;;  %v1785_v24 = vld [vmem:[%s1951_s9] ss:$0 sm:$0xff] }
 0x547   :  { %1282 = vmatmul.msk.f32.vlgmr.msrb.gmra.mxu2 %vm97_vm0, %v714_v32 }
 0x595   :  { %v605_v35 = vpop.xlane.xlu2 %604 }
 0x596   :  { %v606_v61 = vmul.f32 %v605_v35, %v1498_v8 }
 0x598   :  { %v607_v36 = vadd.f32 1e-12, %v606_v61 }
 0x59a   :  { %1362 = vrsqrt.f32 %v607_v36  ;;  %vm614_vm11 = vweird.f32 %v607_v36 }
 0x5a0   :  { %v1363_v37 = vpop.eup %1362 }
 0x5a1   :  { %v609_v38 = vmul.f32 %v1363_v37, %v607_v36  ;;  %vm615_vm10 = vweird.f32 %v1363_v37 }
 0x5a2   :  { %vm616_vm12 = vmor %vm614_vm11, %vm615_vm10 }
 0x5a3   :  { %v610_v41 = vmul.f32 %v1363_v37, %v609_v38 }
 0x5a5   :  { %v611_v17 = vmul.f32 0.5, %v610_v41 }
 0x5a7   :  { %v612_v20 = vsub.f32 1.5, %v611_v17 }
 0x5a9   :  { %v613_v23 = vmul.f32 %v1363_v37, %v612_v20 }
 0x5ab   :  { %v617_v18 = vsel %vm616_vm12, %v1363_v37, %v613_v23 }
 0x5ac   :  { %v618_v21 = vmul.f32 %v617_v18, %v601_v63 }
 0x5ae   :  { %v622_v29 = vmul.f32 %v1780_v15, %v618_v21 }
 0x5b0   :  { %v626_v47 = vadd.f32 %v1785_v24, %v622_v29 }
 0x5b2   :  { %1274 = vmatmul.msk.f32.vlgmr.msrb.gmra.mxu0 %vm97_vm0, %v626_v47 }
 0x5ba   :  { %1281 = vmatmul.msk.f32.vlgmr.msra.gmra.mxu0 %vm97_vm0, %v714_v32 }
 0x5c2   :  { %v735_v52 = vpop.f32.mrf.mxu2  ;;  %v755_v22 = vpop.f32.mrf.mxu3 }
 0x5c3   :  { %v736_v16 = vadd.f32 %v1619_v45, %v735_v52  ;;  %v1824_v55 = vadd.f32 %v1631_v49, %v755_v22  ;;  %v1839_v45 = vld [vmem:[%s1954_s12 + $0x8] sm:$0xff]  ;;  %v1845_v49 = vld [vmem:[%s1954_s12] sm:$0xff] }
 0x5c4   :  { %675 = vmatpush.msrb.mxu1 %v1839_v45 }
 0x5c5   :  { %802 = vrot.lane.b32.xlu1 %v736_v16, %s1409_s3 }
 0x5c6   :  { %676 = vmatpush.msrb.mxu1 %v1845_v49 }
 0x5ca   :  { %v795_v25 = vpop.f32.mrf.mxu2 }
 0x5cb   :  { %v796_v56 = vadd.f32 %v1639_v54, %v795_v25  ;;  %v1851_v54 = vld [vmem:[%s1953_s11] ss:$0 sm:$0xff] }
 0x5cd   :  { %883 = vrot.lane.b32.xlu0 %v796_v56, %s1409_s3  ;;  %829 = vrot.lane.b32.xlu1 %v1824_v55, %s1409_s3  ;;  %v1319_v38 = vpack.i.bf16 %v796_v56, %v736_v16 }
 0x62f   :  { %v650_v58 = vpop.f32.mrf.mxu0 }
 0x630   :  { %v651_v59 = vadd.f32 %v1851_v54, %v650_v58 }
 0x632   :  { %v653_v60 = vmax.f32 %v651_v59, 0.0 }
 0x634   :  { %1275 = vmatmul.msk.f32.vlgmr.msrb.gmra.mxu1 %vm657_vm13, %v653_v60 }
 0x637   :  { %v775_v63 = vpop.f32.mrf.mxu0  ;;  %v803_v1 = vpop.permute.xlu1 %802 }
 0x638   :  { %v1856_v0 = vadd.f32 %v1626_v48, %v775_v63  ;;  %1283 = vmatpush.xpose.msk.msrb.mxu3 %vm236_vm5, %v803_v1 }
 0x63a   :  { %856 = vrot.lane.b32.xlu1 %v1856_v0, %s1409_s3 }
 0x63b   :  { %1284 = vmatmul.msk.f32.vlgmr.msrb.gmra.mxu3 %vm236_vm5, %v736_v16 }
 0x63f   :  { %v884_v2 = vpop.permute.xlu0 %883  ;;  %v830_v3 = vpop.permute.xlu1 %829 }
 0x640   :  { %1285 = vmatpush.xpose.msk.msrb.mxu0 %vm236_vm5, %v830_v3  ;;  %1289 = vmatpush.xpose.msk.msra.mxu2 %vm236_vm5, %v884_v2 }
 0x643   :  { %1286 = vmatmul.msk.f32.vlgmr.msrb.gmra.mxu0 %vm236_vm5, %v1824_v55  ;;  %1290 = vmatmul.msk.f32.vlgmr.msra.gmra.mxu2 %vm236_vm5, %v796_v56 }
 0x6ac   :  { %v857_v48 = vpop.permute.xlu1 %856 }
 0x6ad   :  { %1287 = vmatpush.xpose.msk.msra.mxu1 %vm236_vm5, %v857_v48  ;;  %v1324_v48 = vpack.i.bf16 %v1856_v0, %v1824_v55 }
 0x6b0   :  { %1288 = vmatmul.msk.f32.vlgmr.msra.gmra.mxu1 %vm236_vm5, %v1856_v0 }
 0x6b1   :  { %v678_v6 = vpop.f32.mrf.mxu1 }
 0x6b2   :  { %v679_v7 = vadd.f32 %v1871_v4, %v678_v6 }
 0x6b4   :  { %v681_v10 = vadd.f32 %v679_v7, %v1733_v53 }
 0x6b6   :  { %682 = vst.msk [vmem:[#allocation2] sm:$0xff] %vm97_vm0, %v681_v10 }
 0x6be   :  { %v825_v13 = vpop.f32.mrf.mxu3 }
 0x6bf   :  { %v826_v28 = vadd.f32 %v825_v13, %v799_v12 }
 0x6c0   :  { %v852_v30 = vpop.f32.mrf.mxu0 }
 0x6c1   :  { %v853_v32 = vadd.f32 %v852_v30, %v799_v12  ;;  %v909_v35 = vsel %vm236_vm5, %v826_v28, -inf }
 0x6c2   :  { %910 = vmax.xlane.f32.xlu1 %v909_v35 }
 0x6c3   :  { %v912_v61 = vsel %vm236_vm5, %v853_v32, -inf }
 0x6c4   :  { %913 = vmax.xlane.f32.xlu2 %v912_v61 }
 0x6c6   :  { %v906_v53 = vpop.f32.mrf.mxu2 }
 0x6c7   :  { %v907_v36 = vadd.f32 %v906_v53, %v799_v12 }
 0x6c9   :  { %v918_v37 = vsel %vm236_vm5, %v907_v36, -inf }
 0x6ca   :  { %919 = vmax.xlane.f32.xlu0 %v918_v37 }
 0x6db   :  { %1320 = vrot.lane.b32.xlu1 %v1319_v38, %s1411_s26 }
 0x72d   :  { %v879_v62 = vpop.f32.mrf.mxu1 }
 0x72e   :  { %v880_v41 = vadd.f32 %v879_v62, %v799_v12 }
 0x730   :  { %v915_v17 = vsel %vm236_vm5, %v880_v41, -inf }
 0x731   :  { %916 = vmax.xlane.f32.xlu2 %v915_v17 }
 0x735   :  { %v911_v20 = vpop.xlane.xlu1 %910 }
 0x736   :  { %v921_v23 = vsub.f32 %v826_v28, %v911_v20 }
 0x737   :  { %v914_v18 = vpop.xlane.xlu2 %913 }
 0x738   :  { %v925_v21 = vmul.f32 1.442695, %v921_v23  ;;  %v922_v29 = vsub.f32 %v853_v32, %v914_v18 }
 0x73a   :  { %1364 = vpow2.f32 %v925_v21  ;;  %v927_v47 = vmul.f32 1.442695, %v922_v29 }
 0x73c   :  { %1366 = vpow2.f32 %v927_v47 }
 0x73d   :  { %v920_v52 = vpop.xlane.xlu0 %919 }
 0x73e   :  { %v924_v22 = vsub.f32 %v907_v36, %v920_v52 }
 0x740   :  { %v1365_v25 = vpop.eup %1364  ;;  %v931_v58 = vmul.f32 1.442695, %v924_v22 }
 0x741   :  { %v933_v16 = vsel %vm236_vm5, %v1365_v25, 0.0 }
 0x742   :  { %v1367_v56 = vpop.eup %1366  ;;  %1368 = vpow2.f32 %v931_v58  ;;  %934 = vadd.xlane.f32.xlu2 %v933_v16 }
 0x743   :  { %v936_v59 = vsel %vm236_vm5, %v1367_v56, 0.0 }
 0x744   :  { %937 = vadd.xlane.f32.xlu0 %v936_v59 }
 0x748   :  { %v1369_v60 = vpop.eup %1368 }
 0x749   :  { %v942_v63 = vsel %vm236_vm5, %v1369_v60, 0.0 }
 0x74a   :  { %943 = vadd.xlane.f32.xlu2 %v942_v63 }
 0x74d   :  { %v1321_v1 = vpop.permute.xlu1 %1320 }
 0x74e   :  { %v1323_v2 = vunpack.i.h.bf16 %v1321_v1  ;;  %v1322_v3 = vunpack.i.l.bf16 %v1321_v1 }
 0x750   :  { %981 = vmatpush.msra.mxu3 %v1322_v3  ;;  %1059 = vmatpush.msrb.mxu2 %v1323_v2 }
 0x752   :  { %1082 = vmatpush.msrb.mxu3 %v1681_v40  ;;  %1151 = vmatpush.msra.mxu2 %v1694_v44  ;;  %v1278_v40 = vsel %vm687_vm14, 1.0, %v1412_v5 }
 0x753   :  { %v954_v44 = vperm.slane %v1278_v40, 0 }
 0x758   :  { %1325 = vrot.lane.b32.xlu0 %v1324_v48, %s1411_s26 }
 0x7a4   :  { %v917_v6 = vpop.xlane.xlu2 %916 }
 0x7a5   :  { %v923_v7 = vsub.f32 %v880_v41, %v917_v6 }
 0x7a7   :  { %v929_v10 = vmul.f32 1.442695, %v923_v7 }
 0x7a9   :  { %1370 = vpow2.f32 %v929_v10 }
 0x7af   :  { %v1371_v11 = vpop.eup %1370 }
 0x7b0   :  { %v939_v12 = vsel %vm236_vm5, %v1371_v11, 0.0 }
 0x7b1   :  { %940 = vadd.xlane.f32.xlu2 %v939_v12 }
 0x7b5   :  { %v935_v13 = vpop.xlane.xlu2 %934 }
 0x7b6   :  { %1372 = vrcp.f32 %v935_v13 }
 0x7b7   :  { %v938_v30 = vpop.xlane.xlu0 %937 }
 0x7bc   :  { %v1373_v28 = vpop.eup %1372 }
 0x7bd   :  { %v949_v55 = vmul.f32 %v1373_v28, %v1365_v25  ;;  %v944_v0 = vpop.xlane.xlu2 %943 }
 0x7be   :  { %1374 = vrcp.f32 %v944_v0 }
 0x7bf   :  { %v956_v32 = vmul.f32 %v954_v44, %v949_v55  ;;  %1376 = vrcp.f32 %v938_v30 }
 0x7c1   :  { %1291 = vmatmul.msk.f32.vlgmr.msra.gmra.mxu3 %vm236_vm5, %v956_v32 }
 0x7c2   :  { %1200 = vmatpush.msra.mxu3 %v1751_v33 }
 0x7c4   :  { %v1375_v35 = vpop.eup %1374  ;;  %1201 = vmatpush.msra.mxu3 %v1757_v34 }
 0x7c5   :  { %v1377_v61 = vpop.eup %1376  ;;  %v952_v53 = vmul.f32 %v1375_v35, %v1369_v60 }
 0x7c6   :  { %1202 = vmatpush.msra.mxu3 %v1763_v39  ;;  %v950_v9 = vmul.f32 %v1377_v61, %v1367_v56 }
 0x7c7   :  { %v959_v5 = vmul.f32 %v954_v44, %v952_v53 }
 0x7c8   :  { %1203 = vmatpush.msra.mxu3 %v1768_v42  ;;  %v957_v62 = vmul.f32 %v954_v44, %v950_v9 }
 0x7c9   :  { %1294 = vmatmul.msk.f32.vlgmr.msrb.gmra.mxu2 %vm236_vm5, %v959_v5 }
 0x7ca   :  { %v1326_v36 = vpop.permute.xlu0 %1325 }
 0x7cb   :  { %v1328_v37 = vunpack.i.h.bf16 %v1326_v36  ;;  %v1327_v38 = vunpack.i.l.bf16 %v1326_v36 }
 0x7cd   :  { %1007 = vmatpush.msra.mxu0 %v1327_v38  ;;  %1033 = vmatpush.msrb.mxu1 %v1328_v37 }
 0x7ce   :  { %1292 = vmatmul.msk.f32.vlgmr.msra.gmra.mxu0 %vm236_vm5, %v957_v62 }
 0x7cf   :  { %1128 = vmatpush.msra.mxu1 %v1688_v43  ;;  %1105 = vmatpush.msrb.mxu0 %v1706_v46 }
 0x7d1   :  { %1220 = vmatpush.msra.mxu0 %v1790_v26 }
 0x7d3   :  { %1221 = vmatpush.msra.mxu0 %v1795_v27 }
 0x7d5   :  { %1222 = vmatpush.msra.mxu0 %v1802_v31 }
 0x7d7   :  { %1223 = vmatpush.msra.mxu0 %v1809_v50 }
 0x7d9   :  { %1224 = vmatpush.msra.mxu0 %v1816_v51 }
 0x7db   :  { %1225 = vmatpush.msra.mxu0 %v1833_v57 }
 0x7dd   :  { %1226 = vmatpush.msra.mxu0 %v1839_v45 }
 0x7df   :  { %1227 = vmatpush.msra.mxu0 %v1845_v49 }
 0x824   :  { %v941_v33 = vpop.xlane.xlu2 %940 }
 0x825   :  { %1378 = vrcp.f32 %v941_v33 }
 0x82b   :  { %v1379_v43 = vpop.eup %1378 }
 0x82c   :  { %v951_v46 = vmul.f32 %v1379_v43, %v1371_v11 }
 0x82e   :  { %v958_v34 = vmul.f32 %v954_v44, %v951_v46 }
 0x830   :  { %1293 = vmatmul.msk.f32.vlgmr.msrb.gmra.mxu1 %vm236_vm5, %v958_v34 }
 0x844   :  { %v983_v39 = vpop.f32.mrf.mxu3 }
 0x845   :  { %1295 = vmatmul.msk.f32.vlgmr.msrb.gmra.mxu3 %vm236_vm5, %v983_v39 }
 0x84b   :  { %v1009_v42 = vpop.f32.mrf.mxu0 }
 0x84c   :  { %v1061_v26 = vpop.f32.mrf.mxu2  ;;  %1296 = vmatmul.msk.f32.vlgmr.msrb.gmra.mxu0 %vm236_vm5, %v1009_v42 }
 0x84d   :  { %1298 = vmatmul.msk.f32.vlgmr.msra.gmra.mxu2 %vm236_vm5, %v1061_v26 }
 0x8ad   :  { %v1035_v27 = vpop.f32.mrf.mxu1 }
 0x8ae   :  { %1297 = vmatmul.msk.f32.vlgmr.msra.gmra.mxu1 %vm236_vm5, %v1035_v27 }
 0x8c8   :  { %v1084_v31 = vpop.f32.mrf.mxu3 }
 0x8c9   :  { %v1107_v50 = vpop.f32.mrf.mxu0 }
 0x8ca   :  { %v1156_v51 = vadd.f32 %v1107_v50, %v1084_v31 }
 0x8d0   :  { %v1153_v49 = vpop.f32.mrf.mxu2 }
 0x92b   :  { %v1130_v57 = vpop.f32.mrf.mxu1 }
 0x92c   :  { %v1157_v45 = vadd.f32 %v1156_v51, %v1130_v57 }
 0x92e   :  { %v1158_v41 = vadd.f32 %v1157_v45, %v1153_v49 }
 0x930   :  { %v1159_v17 = vadd.f32 %v1714_v14, %v1158_v41 }
 0x932   :  { %v1160_v20 = vadd.f32 %v1728_v19, %v1159_v17 }
 0x934   :  { %v1161_v23 = vsel %vm97_vm0, %v1160_v20, 0.0 }
 0x935   :  { %1162 = vadd.xlane.f32.xlu2 %v1161_v23 }
 0x9a8   :  { %v1163_v18 = vpop.xlane.xlu2 %1162 }
 0x9a9   :  { %v1164_v21 = vmul.f32 %v1163_v18, %v1498_v8 }
 0x9ab   :  { %v1165_v29 = vsub.f32 %v1160_v20, %v1164_v21 }
 0x9ad   :  { %v1166_v47 = vmul.f32 %v1165_v29, %v1165_v29 }
 0x9af   :  { %v1167_v52 = vsel %vm97_vm0, %v1166_v47, 0.0 }
 0x9b0   :  { %1168 = vadd.xlane.f32.xlu2 %v1167_v52 }
 0xa23   :  { %v1169_v22 = vpop.xlane.xlu2 %1168 }
 0xa24   :  { %v1170_v25 = vmul.f32 %v1169_v22, %v1498_v8 }
 0xa26   :  { %v1171_v58 = vadd.f32 1e-12, %v1170_v25 }
 0xa28   :  { %1380 = vrsqrt.f32 %v1171_v58  ;;  %vm1178_vm1 = vweird.f32 %v1171_v58 }
 0xa2e   :  { %v1381_v16 = vpop.eup %1380 }
 0xa2f   :  { %v1173_v14 = vmul.f32 %v1381_v16, %v1171_v58  ;;  %vm1179_vm15 = vweird.f32 %v1381_v16 }
 0xa30   :  { %vm1180_vm2 = vmor %vm1178_vm1, %vm1179_vm15 }
 0xa31   :  { %v1174_v56 = vmul.f32 %v1381_v16, %v1173_v14 }
 0xa33   :  { %v1175_v19 = vmul.f32 0.5, %v1174_v56 }
 0xa35   :  { %v1176_v59 = vsub.f32 1.5, %v1175_v19 }
 0xa37   :  { %v1177_v60 = vmul.f32 %v1381_v16, %v1176_v59 }
 0xa39   :  { %v1181_v63 = vsel %vm1180_vm2, %v1381_v16, %v1177_v60 }
 0xa3a   :  { %v1182_v1 = vmul.f32 %v1181_v63, %v1165_v29 }
 0xa3c   :  { %v1183_v2 = vmul.f32 %v1780_v15, %v1182_v1 }
 0xa3e   :  { %v1184_v3 = vadd.f32 %v1785_v24, %v1183_v2 }
 0xa40   :  { %1299 = vmatmul.msk.f32.vlgmr.msra.gmra.mxu3 %vm97_vm0, %v1184_v3 }
 0xac3   :  { %v1205_v8 = vpop.f32.mrf.mxu3 }
 0xac4   :  { %v1206_v48 = vadd.f32 %v1851_v54, %v1205_v8 }
 0xac6   :  { %v1208_v6 = vmax.f32 %v1206_v48, 0.0 }
 0xac8   :  { %1300 = vmatmul.msk.f32.vlgmr.msra.gmra.mxu0 %vm657_vm13, %v1208_v6 }
 0xb45   :  { %v1229_v7 = vpop.f32.mrf.mxu0 }
 0xb46   :  { %v1230_v10 = vadd.f32 %v1871_v4, %v1229_v7 }
 0xb48   :  { %v1232_v15 = vadd.f32 %v1230_v10, %v1160_v20 }
 0xb4a   :  { %1234 = vst.msk [vmem:[#allocation2 + $0x8] sm:$0xff] %vm97_vm0, %v1232_v15 }
 0xb4b   :  { %1247 = dma.vmem_to_hbm [thread:$0]  %s1240_s13, 256, %s1242_s10, [#allocation3], %s1414_s25, %s1414_s25, %s1415_s27  }
 0xb4c   :  { %1406 = dma.done.wait [#allocation3], 256  }
 0xb4d   :  { %1407 = vsyncadd [#allocation3], 4294967040 }
 0xb4e   :  { %1252 = vsyncpa [#allocation3], 1 }

</bundles_post_ra>
